<compile_context>
chip_gen: v7x
topology: tpu7x:2x2x1
jax: 0.10.0
libtpu: 0.0.40
codegen_flags: <defaults>
</compile_context>

<pallas_src>
import functools

import jax
import jax.numpy as jnp
from jax import lax
from jax.experimental import pallas as pl
from jax.experimental.pallas import tpu as pltpu


def _errors_kernel(x_ref, lab_ref, key_ref):
    """Elementwise hot path: p = exp(x), err = |fg - p|, emit -(err) with fg in LSB."""
    x = x_ref[0]                          # (C, TN) logits
    lab = lab_ref[0]                      # (1, TN) int32 labels
    C, TN = x.shape
    c_idx = lax.broadcasted_iota(jnp.int32, (C, TN), 0)
    fg = lab == c_idx                     # (C, TN) bool, broadcast over classes
    # exp() of the module's input; clamp so a pathological logit can't become inf
    # (inf with the LSB set would be NaN and poison the sort).
    p = jnp.exp(jnp.minimum(x, 80.0))
    neg_err = -jnp.abs(fg.astype(jnp.float32) - p)
    bits = pltpu.bitcast(neg_err, jnp.uint32)
    bits = (bits & jnp.uint32(0xFFFFFFFE)) | fg.astype(jnp.uint32)
    key_ref[...] = pltpu.bitcast(bits, jnp.float32)


def _lovasz_kernel(gts_ref, key_ref, out_ref, carry_ref, acc_ref):
    """Blocked Lovasz reduction over globally sorted keys (one class group)."""
    i = pl.program_id(1)
    nb = pl.num_programs(1)

    @pl.when(i == 0)
    def _init():
        carry_ref[...] = jnp.zeros_like(carry_ref)
        acc_ref[...] = jnp.zeros_like(acc_ref)

    key = key_ref[0]                      # (Cg, TN) f32: -err, LSB == fg, sorted asc
    gts = gts_ref[0]                      # (Cg, 1)  f32: global per-class fg counts
    Cg, TN = key.shape

    bits = pltpu.bitcast(key, jnp.uint32)
    fg = (bits & jnp.uint32(1)).astype(jnp.float32)        # foreground bit
    err = -key                                             # |fg - p| (up to 1 ulp)

    # Block-local inclusive cumsum of fg along lanes: Hillis-Steele shift-adds via
    # pltpu.roll (XLU slot) -- no TNxTN tri operand, no MXU, exact for 0/1 in f32.
    lane = lax.broadcasted_iota(jnp.int32, (Cg, TN), 1)
    cum = fg
    k = 1
    while k < TN:                         # static unrolled log2(TN) steps
        cum = cum + jnp.where(lane >= k, pltpu.roll(cum, shift=k, axis=1), 0.0)
        k *= 2
    cum_fg = carry_ref[...] + cum         # global inclusive cumsum(fg)

    # Global 1-based position; cumsum(1 - fg) == pos1 - cumsum(fg) (exact, N < 2^24).
    pos1 = (i * TN + 1).astype(jnp.float32) + lane.astype(jnp.float32)

    inter = gts - cum_fg
    union = gts + (pos1 - cum_fg)                          # >= 1 at every position
    # Previous-position (exclusive) variants, derived without a roll.
    inter_prev = inter + fg
    union_prev = union - 1.0 + fg
    union_prev = jnp.where(union_prev < 0.5, 1.0, union_prev)  # absent class @ pos 1

    # grad = jaccard_prev - jaccard with TWO reciprocals (EUP slot is idle), so the
    # ~N-magnitude products never cancel catastrophically in f32.
    grad = inter_prev * pl.reciprocal(union_prev) - inter * pl.reciprocal(union)

    acc_ref[...] += jnp.sum(err * grad, axis=1, keepdims=True)   # per-class partials
    carry_ref[...] += jnp.sum(fg, axis=1, keepdims=True)         # carry to next block

    @pl.when(i == nb - 1)
    def _finalize():
        out_ref[0] = acc_ref[...]         # per-class loss for this class group


def _round_up(x, m):
    return ((x + m - 1) // m) * m


def _pick_err_tile(m, cap=32768):
    """Lane tile for the error kernel: multiple of 128, large, low padding waste."""
    m128 = _round_up(m, 128)
    if m128 <= cap:
        return m128
    best_t, best_pad = cap, _round_up(m, cap) - m
    t = cap - 128
    while t >= cap // 2 and best_pad > 0:
        pad = _round_up(m, t) - m
        if pad < best_pad:
            best_t, best_pad = t, pad
        t -= 128
    return best_t


def _pick_sorted_tile(n_pad, cap=32768):
    """Largest multiple of 128 that divides n_pad (no re-padding after the sort)."""
    best, t = 128, 128
    while t <= min(cap, n_pad):
        if n_pad % t == 0:
            best = t
        t += 128
    return best


@functools.partial(jax.jit, static_argnames=("block_n1", "block_n2", "class_groups"))
def lovasz_softmax_3d_loss(logits, labels, block_n1=None, block_n2=None,
                           class_groups=None):
    """logits: [B, C, D, H, W] float32, labels: [B, D, H, W] int -> scalar loss."""
    B, C, D, H, W = logits.shape
    M = D * H * W

    tn1 = block_n1 if block_n1 is not None else _pick_err_tile(M)
    tn1 = _round_up(tn1, 128)
    m_pad = _round_up(M, tn1)
    nb1 = m_pad // tn1
    n_pad = B * m_pad

    # ---- kernel 1: fused exp / |fg - p| / key packing (no pre-transpose) ---------
    x3 = logits.reshape(B, C, M).astype(jnp.float32)        # free reshape
    lab3 = labels.reshape(B, 1, M).astype(jnp.int32)
    if m_pad != M:
        # Inert padding: p = exp(-1e30) = 0 and label C matches no class, so
        # err = 0, fg = 0; padded elements sort to the tail and contribute 0.
        x3 = jnp.pad(x3, ((0, 0), (0, 0), (0, m_pad - M)), constant_values=-1e30)
        lab3 = jnp.pad(lab3, ((0, 0), (0, 0), (0, m_pad - M)), constant_values=C)

    neg_keys = pl.pallas_call(
        _errors_kernel,
        out_shape=jax.ShapeDtypeStruct((C, n_pad), jnp.float32),
        grid=(B, nb1),
        in_specs=[pl.BlockSpec((1, C, tn1), lambda b, j: (b, 0, j)),
                  pl.BlockSpec((1, 1, tn1), lambda b, j: (b, 0, j))],
        out_specs=pl.BlockSpec((C, tn1), lambda b, j: (0, b * nb1 + j)),
        compiler_params=pltpu.CompilerParams(
            dimension_semantics=("parallel", "parallel"),
            vmem_limit_bytes=64 * 1024 * 1024),
    )(x3, lab3)

    # Global per-class foreground counts: fused compare+reduce (no XLA scatter-add).
    cls = jnp.arange(C, dtype=jnp.int32)
    gts = jnp.sum(
        (labels.reshape(1, -1).astype(jnp.int32) == cls[:, None]).astype(jnp.float32),
        axis=1)                                             # (C,)

    # TODO(synk): the global per-class descending sort has no clean Pallas TPU
    # equivalent; done as ONE single-operand ascending lax.sort of the negated key
    # (fg rides in the mantissa LSB, so no value operand and no re-negation pass).
    keys_sorted = lax.sort(neg_keys, dimension=1, is_stable=False)

    # ---- kernel 2: blocked Lovasz reduction over the sorted keys ------------------
    ng = class_groups if class_groups is not None else (2 if C % 2 == 0 and C >= 2 else 1)
    if C % ng != 0:
        ng = 1
    cg = C // ng                                            # classes per group
    tn2 = block_n2 if block_n2 is not None else _pick_sorted_tile(n_pad)
    if n_pad % tn2 != 0:
        tn2 = _pick_sorted_tile(n_pad)
    nb2 = n_pad // tn2

    keys_g = keys_sorted.reshape(ng, cg, n_pad)             # free reshape
    gts_g = gts.reshape(ng, cg, 1)

    per_class = pl.pallas_call(
        _lovasz_kernel,
        out_shape=jax.ShapeDtypeStruct((ng, cg, 1), jnp.float32),
        grid=(ng, nb2),
        in_specs=[pl.BlockSpec((1, cg, 1), lambda g, i: (g, 0, 0)),     # gts
                  pl.BlockSpec((1, cg, tn2), lambda g, i: (g, 0, i))],  # sorted keys
        out_specs=pl.BlockSpec((1, cg, 1), lambda g, i: (g, 0, 0)),
        scratch_shapes=[pltpu.VMEM((cg, 1), jnp.float32),    # carry: cumsum(fg)
                        pltpu.VMEM((cg, 1), jnp.float32)],   # acc: per-class loss
        compiler_params=pltpu.CompilerParams(
            dimension_semantics=("parallel", "arbitrary"),
            vmem_limit_bytes=64 * 1024 * 1024),
    )(gts_g, keys_g)

    # classes='present' mean (tiny, in glue so kernel 2 stays class-parallel).
    present = (gts > 0.0).astype(jnp.float32)
    return jnp.sum(per_class.reshape(C) * present) / jnp.sum(present)


def _reference_loss(logits, labels):
    """Pure-JAX mirror of the PyTorch lovasz_softmax_3d (classes='present')."""
    B, C, D, H, W = logits.shape
    probas = jnp.exp(logits)
    p = jnp.transpose(probas, (0, 2, 3, 4, 1)).reshape(-1, C)
    lab = labels.reshape(-1)
    num = jnp.float32(0.0)
    den = jnp.float32(0.0)
    for c in range(C):
        fg = (lab == c).astype(jnp.float32)
        present = (fg.sum() > 0).astype(jnp.float32)
        errors = jnp.abs(fg - p[:, c])
        perm = jnp.argsort(-errors)
        errors_sorted = errors[perm]
        fg_sorted = fg[perm]
        gts = fg_sorted.sum()
        inter = gts - jnp.cumsum(fg_sorted)
        union = gts + jnp.cumsum(1.0 - fg_sorted)
        jac = 1.0 - inter / union
        grad = jnp.concatenate([jac[:1], jac[1:] - jac[:-1]])
        num = num + present * jnp.dot(errors_sorted, grad)
        den = den + present
    return num / den


if __name__ == "__main__":
    key = jax.random.PRNGKey(0)
    k1, k2, k3, k4 = jax.random.split(key, 4)

    # Regular shape: exercises multi-block error grid, cross-block carries and the
    # two-class-group "parallel" split in kernel 2.
    B, C, D, H, W = 2, 4, 4, 8, 16
    logits = jax.random.normal(k1, (B, C, D, H, W), dtype=jnp.float32)
    labels = jax.random.randint(k2, (B, D, H, W), 0, C, dtype=jnp.int32)
    loss = jax.block_until_ready(
        lovasz_softmax_3d_loss(logits, labels, block_n1=256, block_n2=512))
    ref = jax.block_until_ready(_reference_loss(logits, labels))
    if not jnp.allclose(loss, ref, atol=1e-3, rtol=1e-3):
        raise AssertionError(f"mismatch (regular): kernel={loss} ref={ref}")

    # Irregular shape: exercises the inert-padding path (M not a tile multiple).
    B2, C2, D2, H2, W2 = 1, 4, 3, 5, 7
    logits2 = jax.random.normal(k3, (B2, C2, D2, H2, W2), dtype=jnp.float32)
    labels2 = jax.random.randint(k4, (B2, D2, H2, W2), 0, C2, dtype=jnp.int32)
    loss2 = jax.block_until_ready(lovasz_softmax_3d_loss(logits2, labels2))
    ref2 = jax.block_until_ready(_reference_loss(logits2, labels2))
    if not jnp.allclose(loss2, ref2, atol=1e-3, rtol=1e-3):
        raise AssertionError(f"mismatch (padded): kernel={loss2} ref={ref2}")

    print("KERNEL_OK")
</pallas_src>

<mosaic_0001>
module attributes {stable_mosaic.version = 11 : i64} {
  func.func @_errors_kernel(%arg0: i32, %arg1: i32, %arg2: memref<1x4x256xf32, #tpu.memory_space<vmem>>, %arg3: memref<1x1x256xi32, #tpu.memory_space<vmem>>, %arg4: memref<4x256xf32, #tpu.memory_space<vmem>>) attributes {dimension_semantics = [#tpu.dimension_semantics<parallel>, #tpu.dimension_semantics<parallel>], iteration_bounds = array<i64: 2, 2>, scalar_prefetch = 0 : i64, scratch_operands = 0 : i64, tpu.core_type = #tpu.core_type<tc>, window_params = [{transform_indices = @transform_0, window_bounds = array<i64: 1, 4, 256>}, {transform_indices = @transform_1, window_bounds = array<i64: 1, 1, 256>}, {transform_indices = @transform_2, window_bounds = array<i64: 4, 256>}]} {
    %c0 = arith.constant 0 : index
    %c0_0 = arith.constant 0 : index
    %c0_1 = arith.constant 0 : index
    %0 = vector.load %arg2[%c0, %c0_0, %c0_1] : memref<1x4x256xf32, #tpu.memory_space<vmem>>, vector<1x4x256xf32>
    %1 = vector.shape_cast %0 : vector<1x4x256xf32> to vector<4x256xf32>
    %c0_2 = arith.constant 0 : index
    %c0_3 = arith.constant 0 : index
    %c0_4 = arith.constant 0 : index
    %2 = vector.load %arg3[%c0_2, %c0_3, %c0_4] : memref<1x1x256xi32, #tpu.memory_space<vmem>>, vector<1x1x256xi32>
    %3 = vector.shape_cast %2 : vector<1x1x256xi32> to vector<1x256xi32>
    %4 = tpu.iota {dimensions = array<i32: 0>} : vector<4x256xi32>
    %5 = vector.broadcast %3 : vector<1x256xi32> to vector<4x256xi32>
    %6 = arith.cmpi eq, %5, %4 : vector<4x256xi32>
    %cst = arith.constant 8.000000e+01 : f32
    %7 = vector.broadcast %cst : f32 to vector<4x256xf32>
    %8 = arith.minimumf %1, %7 : vector<4x256xf32>
    %9 = math.exp %8 : vector<4x256xf32>
    %10 = arith.extui %6 : vector<4x256xi1> to vector<4x256xi32>
    %11 = arith.sitofp %10 : vector<4x256xi32> to vector<4x256xf32>
    %12 = arith.subf %11, %9 : vector<4x256xf32>
    %13 = math.absf %12 : vector<4x256xf32>
    %cst_5 = arith.constant 0.000000e+00 : f32
    %14 = vector.broadcast %cst_5 : f32 to vector<4x256xf32>
    %15 = arith.subf %14, %13 : vector<4x256xf32>
    %16 = tpu.bitcast %15 : vector<4x256xf32> -> vector<4x256xi32>
    %c-2_i32 = arith.constant -2 : i32
    %17 = vector.broadcast %c-2_i32 : i32 to vector<4x256xi32>
    %18 = arith.andi %16, %17 : vector<4x256xi32>
    %19 = arith.extui %6 : vector<4x256xi1> to vector<4x256xi32>
    %20 = arith.ori %18, %19 : vector<4x256xi32>
    %21 = tpu.bitcast %20 : vector<4x256xi32> -> vector<4x256xf32>
    %c0_6 = arith.constant 0 : index
    %c0_7 = arith.constant 0 : index
    %22 = vector.load %arg4[%c0_6, %c0_7] : memref<4x256xf32, #tpu.memory_space<vmem>>, vector<4x256xf32>
    tpu.vector_store %arg4[%c0_6, %c0_7], %21 {strides = array<i32>} : memref<4x256xf32, #tpu.memory_space<vmem>>, vector<4x256xf32>,
    return
  }
  func.func @transform_0(%arg0: i32, %arg1: i32) -> (i32, i32, i32) {
    %c0_i32 = arith.constant 0 : i32
    %c0_i32_0 = arith.constant 0 : i32
    return %arg0, %c0_i32, %arg1 : i32, i32, i32
  }
  func.func @transform_1(%arg0: i32, %arg1: i32) -> (i32, i32, i32) {
    %c0_i32 = arith.constant 0 : i32
    %c0_i32_0 = arith.constant 0 : i32
    return %arg0, %c0_i32, %arg1 : i32, i32, i32
  }
  func.func @transform_2(%arg0: i32, %arg1: i32) -> (i32, i32) {
    %c2_i32 = arith.constant 2 : i32
    %0 = arith.muli %arg0, %c2_i32 : i32
    %1 = arith.addi %0, %arg1 : i32
    %c0_i32 = arith.constant 0 : i32
    %c0_i32_0 = arith.constant 0 : i32
    return %c0_i32, %1 : i32, i32
  }
}

module attributes {stable_mosaic.version = 11 : i64} {
  func.func @_lovasz_kernel(%arg0: i32, %arg1: i32, %arg2: memref<1x2x1xf32, #tpu.memory_space<vmem>>, %arg3: memref<1x2x512xf32, #tpu.memory_space<vmem>>, %arg4: memref<1x2x1xf32, #tpu.memory_space<vmem>>, %arg5: memref<2x1xf32, #tpu.memory_space<vmem>>, %arg6: memref<2x1xf32, #tpu.memory_space<vmem>>) attributes {dimension_semantics = [#tpu.dimension_semantics<parallel>, #tpu.dimension_semantics<arbitrary>], iteration_bounds = array<i64: 2, 2>, scalar_prefetch = 0 : i64, scratch_operands = 2 : i64, tpu.core_type = #tpu.core_type<tc>, window_params = [{transform_indices = @transform_0, window_bounds = array<i64: 1, 2, 1>}, {transform_indices = @transform_1, window_bounds = array<i64: 1, 2, 512>}, {transform_indices = @transform_2, window_bounds = array<i64: 1, 2, 1>}]} {
    %c0_i32 = arith.constant 0 : i32
    %0 = arith.cmpi eq, %arg1, %c0_i32 : i32
    %1 = arith.extui %0 : i1 to i32
    %c0_i32_0 = arith.constant 0 : i32
    %2 = arith.cmpi ne, %1, %c0_i32_0 : i32
    scf.if %2 {
      %cst_43 = arith.constant 0.000000e+00 : f32
      %109 = vector.broadcast %cst_43 : f32 to vector<2x1xf32>
      %c0_44 = arith.constant 0 : index
      %c0_45 = arith.constant 0 : index
      %110 = vector.load %arg5[%c0_44, %c0_45] : memref<2x1xf32, #tpu.memory_space<vmem>>, vector<2x1xf32>
      tpu.vector_store %arg5[%c0_44, %c0_45], %109 {strides = array<i32>} : memref<2x1xf32, #tpu.memory_space<vmem>>, vector<2x1xf32>,
      %cst_46 = arith.constant 0.000000e+00 : f32
      %111 = vector.broadcast %cst_46 : f32 to vector<2x1xf32>
      %c0_47 = arith.constant 0 : index
      %c0_48 = arith.constant 0 : index
      %112 = vector.load %arg6[%c0_47, %c0_48] : memref<2x1xf32, #tpu.memory_space<vmem>>, vector<2x1xf32>
      tpu.vector_store %arg6[%c0_47, %c0_48], %111 {strides = array<i32>} : memref<2x1xf32, #tpu.memory_space<vmem>>, vector<2x1xf32>,
    } else {
    }
    %c0 = arith.constant 0 : index
    %c0_1 = arith.constant 0 : index
    %c0_2 = arith.constant 0 : index
    %3 = vector.load %arg3[%c0, %c0_1, %c0_2] : memref<1x2x512xf32, #tpu.memory_space<vmem>>, vector<1x2x512xf32>
    %4 = vector.shape_cast %3 : vector<1x2x512xf32> to vector<2x512xf32>
    %c0_3 = arith.constant 0 : index
    %c0_4 = arith.constant 0 : index
    %c0_5 = arith.constant 0 : index
    %5 = vector.load %arg2[%c0_3, %c0_4, %c0_5] : memref<1x2x1xf32, #tpu.memory_space<vmem>>, vector<1x2x1xf32>
    %6 = vector.shape_cast %5 : vector<1x2x1xf32> to vector<2x1xf32>
    %7 = tpu.bitcast %4 : vector<2x512xf32> -> vector<2x512xi32>
    %c1_i32 = arith.constant 1 : i32
    %8 = vector.broadcast %c1_i32 : i32 to vector<2x512xi32>
    %9 = arith.andi %7, %8 : vector<2x512xi32>
    %10 = arith.uitofp %9 : vector<2x512xi32> to vector<2x512xf32>
    %cst = arith.constant 0.000000e+00 : f32
    %11 = vector.broadcast %cst : f32 to vector<2x512xf32>
    %12 = arith.subf %11, %4 : vector<2x512xf32>
    %13 = tpu.iota {dimensions = array<i32: 1>} : vector<2x512xi32>
    %c1_i32_6 = arith.constant 1 : i32
    %14 = vector.broadcast %c1_i32_6 : i32 to vector<2x512xi32>
    %15 = arith.cmpi sge, %13, %14 : vector<2x512xi32>
    %c1_i32_7 = arith.constant 1 : i32
    %16 = tpu.dynamic_rotate %10 by %c1_i32_7 dim 1 : vector<2x512xf32>, i32 -> vector<2x512xf32>
    %cst_8 = arith.constant 0.000000e+00 : f32
    %17 = vector.broadcast %cst_8 : f32 to vector<2x512xf32>
    %18 = arith.select %15, %16, %17 : vector<2x512xi1>, vector<2x512xf32>
    %19 = arith.addf %10, %18 : vector<2x512xf32>
    %c2_i32 = arith.constant 2 : i32
    %20 = vector.broadcast %c2_i32 : i32 to vector<2x512xi32>
    %21 = arith.cmpi sge, %13, %20 : vector<2x512xi32>
    %c2_i32_9 = arith.constant 2 : i32
    %22 = tpu.dynamic_rotate %19 by %c2_i32_9 dim 1 : vector<2x512xf32>, i32 -> vector<2x512xf32>
    %cst_10 = arith.constant 0.000000e+00 : f32
    %23 = vector.broadcast %cst_10 : f32 to vector<2x512xf32>
    %24 = arith.select %21, %22, %23 : vector<2x512xi1>, vector<2x512xf32>
    %25 = arith.addf %19, %24 : vector<2x512xf32>
    %c4_i32 = arith.constant 4 : i32
    %26 = vector.broadcast %c4_i32 : i32 to vector<2x512xi32>
    %27 = arith.cmpi sge, %13, %26 : vector<2x512xi32>
    %c4_i32_11 = arith.constant 4 : i32
    %28 = tpu.dynamic_rotate %25 by %c4_i32_11 dim 1 : vector<2x512xf32>, i32 -> vector<2x512xf32>
    %cst_12 = arith.constant 0.000000e+00 : f32
    %29 = vector.broadcast %cst_12 : f32 to vector<2x512xf32>
    %30 = arith.select %27, %28, %29 : vector<2x512xi1>, vector<2x512xf32>
    %31 = arith.addf %25, %30 : vector<2x512xf32>
    %c8_i32 = arith.constant 8 : i32
    %32 = vector.broadcast %c8_i32 : i32 to vector<2x512xi32>
    %33 = arith.cmpi sge, %13, %32 : vector<2x512xi32>
    %c8_i32_13 = arith.constant 8 : i32
    %34 = tpu.dynamic_rotate %31 by %c8_i32_13 dim 1 : vector<2x512xf32>, i32 -> vector<2x512xf32>
    %cst_14 = arith.constant 0.000000e+00 : f32
    %35 = vector.broadcast %cst_14 : f32 to vector<2x512xf32>
    %36 = arith.select %33, %34, %35 : vector<2x512xi1>, vector<2x512xf32>
    %37 = arith.addf %31, %36 : vector<2x512xf32>
    %c16_i32 = arith.constant 16 : i32
    %38 = vector.broadcast %c16_i32 : i32 to vector<2x512xi32>
    %39 = arith.cmpi sge, %13, %38 : vector<2x512xi32>
    %c16_i32_15 = arith.constant 16 : i32
    %40 = tpu.dynamic_rotate %37 by %c16_i32_15 dim 1 : vector<2x512xf32>, i32 -> vector<2x512xf32>
    %cst_16 = arith.constant 0.000000e+00 : f32
    %41 = vector.broadcast %cst_16 : f32 to vector<2x512xf32>
    %42 = arith.select %39, %40, %41 : vector<2x512xi1>, vector<2x512xf32>
    %43 = arith.addf %37, %42 : vector<2x512xf32>
    %c32_i32 = arith.constant 32 : i32
    %44 = vector.broadcast %c32_i32 : i32 to vector<2x512xi32>
    %45 = arith.cmpi sge, %13, %44 : vector<2x512xi32>
    %c32_i32_17 = arith.constant 32 : i32
    %46 = tpu.dynamic_rotate %43 by %c32_i32_17 dim 1 : vector<2x512xf32>, i32 -> vector<2x512xf32>
    %cst_18 = arith.constant 0.000000e+00 : f32
    %47 = vector.broadcast %cst_18 : f32 to vector<2x512xf32>
    %48 = arith.select %45, %46, %47 : vector<2x512xi1>, vector<2x512xf32>
    %49 = arith.addf %43, %48 : vector<2x512xf32>
    %c64_i32 = arith.constant 64 : i32
    %50 = vector.broadcast %c64_i32 : i32 to vector<2x512xi32>
    %51 = arith.cmpi sge, %13, %50 : vector<2x512xi32>
    %c64_i32_19 = arith.constant 64 : i32
    %52 = tpu.dynamic_rotate %49 by %c64_i32_19 dim 1 : vector<2x512xf32>, i32 -> vector<2x512xf32>
    %cst_20 = arith.constant 0.000000e+00 : f32
    %53 = vector.broadcast %cst_20 : f32 to vector<2x512xf32>
    %54 = arith.select %51, %52, %53 : vector<2x512xi1>, vector<2x512xf32>
    %55 = arith.addf %49, %54 : vector<2x512xf32>
    %c128_i32 = arith.constant 128 : i32
    %56 = vector.broadcast %c128_i32 : i32 to vector<2x512xi32>
    %57 = arith.cmpi sge, %13, %56 : vector<2x512xi32>
    %c128_i32_21 = arith.constant 128 : i32
    %58 = tpu.dynamic_rotate %55 by %c128_i32_21 dim 1 : vector<2x512xf32>, i32 -> vector<2x512xf32>
    %cst_22 = arith.constant 0.000000e+00 : f32
    %59 = vector.broadcast %cst_22 : f32 to vector<2x512xf32>
    %60 = arith.select %57, %58, %59 : vector<2x512xi1>, vector<2x512xf32>
    %61 = arith.addf %55, %60 : vector<2x512xf32>
    %c256_i32 = arith.constant 256 : i32
    %62 = vector.broadcast %c256_i32 : i32 to vector<2x512xi32>
    %63 = arith.cmpi sge, %13, %62 : vector<2x512xi32>
    %c256_i32_23 = arith.constant 256 : i32
    %64 = tpu.dynamic_rotate %61 by %c256_i32_23 dim 1 : vector<2x512xf32>, i32 -> vector<2x512xf32>
    %cst_24 = arith.constant 0.000000e+00 : f32
    %65 = vector.broadcast %cst_24 : f32 to vector<2x512xf32>
    %66 = arith.select %63, %64, %65 : vector<2x512xi1>, vector<2x512xf32>
    %67 = arith.addf %61, %66 : vector<2x512xf32>
    %c0_25 = arith.constant 0 : index
    %c0_26 = arith.constant 0 : index
    %68 = vector.load %arg5[%c0_25, %c0_26] : memref<2x1xf32, #tpu.memory_space<vmem>>, vector<2x1xf32>
    %69 = vector.broadcast %68 : vector<2x1xf32> to vector<2x512xf32>
    %70 = arith.addf %69, %67 : vector<2x512xf32>
    %c512_i32 = arith.constant 512 : i32
    %71 = arith.muli %arg1, %c512_i32 : i32
    %c1_i32_27 = arith.constant 1 : i32
    %72 = arith.addi %71, %c1_i32_27 : i32
    %73 = arith.sitofp %72 : i32 to f32
    %74 = arith.sitofp %13 : vector<2x512xi32> to vector<2x512xf32>
    %75 = vector.broadcast %73 : f32 to vector<2x512xf32>
    %76 = arith.addf %75, %74 : vector<2x512xf32>
    %77 = vector.broadcast %6 : vector<2x1xf32> to vector<2x512xf32>
    %78 = arith.subf %77, %70 : vector<2x512xf32>
    %79 = arith.subf %76, %70 : vector<2x512xf32>
    %80 = vector.broadcast %6 : vector<2x1xf32> to vector<2x512xf32>
    %81 = arith.addf %80, %79 : vector<2x512xf32>
    %82 = arith.addf %78, %10 : vector<2x512xf32>
    %cst_28 = arith.constant 1.000000e+00 : f32
    %83 = vector.broadcast %cst_28 : f32 to vector<2x512xf32>
    %84 = arith.subf %81, %83 : vector<2x512xf32>
    %85 = arith.addf %84, %10 : vector<2x512xf32>
    %cst_29 = arith.constant 5.000000e-01 : f32
    %86 = vector.broadcast %cst_29 : f32 to vector<2x512xf32>
    %87 = arith.cmpf olt, %85, %86 : vector<2x512xf32>
    %cst_30 = arith.constant 1.000000e+00 : f32
    %88 = vector.broadcast %cst_30 : f32 to vector<2x512xf32>
    %89 = arith.select %87, %88, %85 : vector<2x512xi1>, vector<2x512xf32>
    %90 = tpu.reciprocal %89 : vector<2x512xf32> -> vector<2x512xf32>
    %91 = arith.mulf %82, %90 : vector<2x512xf32>
    %92 = tpu.reciprocal %81 : vector<2x512xf32> -> vector<2x512xf32>
    %93 = arith.mulf %78, %92 : vector<2x512xf32>
    %94 = arith.subf %91, %93 : vector<2x512xf32>
    %c0_31 = arith.constant 0 : index
    %c0_32 = arith.constant 0 : index
    %95 = vector.load %arg6[%c0_31, %c0_32] : memref<2x1xf32, #tpu.memory_space<vmem>>, vector<2x1xf32>
    %96 = arith.mulf %12, %94 : vector<2x512xf32>
    %cst_33 = arith.constant dense<0.000000e+00> : vector<2xf32>
    %97 = vector.multi_reduction <add>, %96, %cst_33 [1] : vector<2x512xf32> to vector<2xf32>
    %98 = vector.shape_cast %97 : vector<2xf32> to vector<2x1xf32>
    %99 = arith.addf %95, %98 : vector<2x1xf32>
    %c0_34 = arith.constant 0 : index
    %c0_35 = arith.constant 0 : index
    %100 = vector.load %arg6[%c0_34, %c0_35] : memref<2x1xf32, #tpu.memory_space<vmem>>, vector<2x1xf32>
    tpu.vector_store %arg6[%c0_34, %c0_35], %99 {strides = array<i32>} : memref<2x1xf32, #tpu.memory_space<vmem>>, vector<2x1xf32>,
    %c0_36 = arith.constant 0 : index
    %c0_37 = arith.constant 0 : index
    %101 = vector.load %arg5[%c0_36, %c0_37] : memref<2x1xf32, #tpu.memory_space<vmem>>, vector<2x1xf32>
    %cst_38 = arith.constant dense<0.000000e+00> : vector<2xf32>
    %102 = vector.multi_reduction <add>, %10, %cst_38 [1] : vector<2x512xf32> to vector<2xf32>
    %103 = vector.shape_cast %102 : vector<2xf32> to vector<2x1xf32>
    %104 = arith.addf %101, %103 : vector<2x1xf32>
    %c0_39 = arith.constant 0 : index
    %c0_40 = arith.constant 0 : index
    %105 = vector.load %arg5[%c0_39, %c0_40] : memref<2x1xf32, #tpu.memory_space<vmem>>, vector<2x1xf32>
    tpu.vector_store %arg5[%c0_39, %c0_40], %104 {strides = array<i32>} : memref<2x1xf32, #tpu.memory_space<vmem>>, vector<2x1xf32>,
    %c1_i32_41 = arith.constant 1 : i32
    %106 = arith.cmpi eq, %arg1, %c1_i32_41 : i32
    %107 = arith.extui %106 : i1 to i32
    %c0_i32_42 = arith.constant 0 : i32
    %108 = arith.cmpi ne, %107, %c0_i32_42 : i32
    scf.if %108 {
      %c0_43 = arith.constant 0 : index
      %c0_44 = arith.constant 0 : index
      %109 = vector.load %arg6[%c0_43, %c0_44] : memref<2x1xf32, #tpu.memory_space<vmem>>, vector<2x1xf32>
      %c0_45 = arith.constant 0 : index
      %c0_46 = arith.constant 0 : index
      %c0_47 = arith.constant 0 : index
      %110 = vector.load %arg4[%c0_45, %c0_46, %c0_47] : memref<1x2x1xf32, #tpu.memory_space<vmem>>, vector<1x2x1xf32>
      %111 = vector.shape_cast %110 : vector<1x2x1xf32> to vector<2x1xf32>
      %112 = vector.shape_cast %109 : vector<2x1xf32> to vector<1x2x1xf32>
      tpu.vector_store %arg4[%c0_45, %c0_46, %c0_47], %112 {strides = array<i32>} : memref<1x2x1xf32, #tpu.memory_space<vmem>>, vector<1x2x1xf32>,
    } else {
    }
    return
  }
  func.func @transform_0(%arg0: i32, %arg1: i32) -> (i32, i32, i32) {
    %c0_i32 = arith.constant 0 : i32
    %c0_i32_0 = arith.constant 0 : i32
    %c0_i32_1 = arith.constant 0 : i32
    return %arg0, %c0_i32, %c0_i32_0 : i32, i32, i32
  }
  func.func @transform_1(%arg0: i32, %arg1: i32) -> (i32, i32, i32) {
    %c0_i32 = arith.constant 0 : i32
    %c0_i32_0 = arith.constant 0 : i32
    return %arg0, %c0_i32, %arg1 : i32, i32, i32
  }
  func.func @transform_2(%arg0: i32, %arg1: i32) -> (i32, i32, i32) {
    %c0_i32 = arith.constant 0 : i32
    %c0_i32_0 = arith.constant 0 : i32
    %c0_i32_1 = arith.constant 0 : i32
    return %arg0, %c0_i32, %c0_i32_0 : i32, i32, i32
  }
}

</mosaic_0001>

<bundles_post_ra>
// kernel: eq.12
= control target key start
LH: loop header
LB: loop body
LE: loop exit
PB: predicated region body
PF: predicated region fallthrough
CT: control target
= control target key end

     0   :  { %vm4_vm0 = vcmask 1047556   ;;  %s99_s14 = smov 112   ;;  %s100_s19 = smov 80   ;;  %vm6_vm1 = vcmask 130048   ;;  %vm16_vm2 = vcmask 1048448   ;;  %vm26_vm3 = vcmask 917248   ;;  %s196_s0 = inlined_call_operand.vmem [shape: s32[2,4,8,16], index: 0, kind: input, shape index: {}]   ;;  %s197_s1 = inlined_call_operand.vmem [shape: s32[1024], index: 1, kind: output, shape index: {}]  }
   0x1   :  { %v78_v0 = vld [vmem:[%s196_s0 + $0x7] ss:$8 sm:$0xf]   ;;  %v82_v3 = vld [vmem:[%s196_s0 + $0x5] ss:$8 sm:$0xf]  }
   0x2   :  { %v79_v1 = vld [vmem:[%s196_s0 + $0x7] ss:$8 sm:$0xf0]   ;;  %v83_v4 = vld [vmem:[%s196_s0 + $0x5] ss:$8 sm:$0xf0]  }
   0x3   :  { %v13_v2 = vsel %vm4_vm0, %v79_v1, %v78_v0  ;;  %v33_v5 = vsel %vm4_vm0, %v83_v4, %v82_v3  ;;  %v80_v6 = vld [vmem:[%s196_s0 + $0x6] ss:$8 sm:$0xf]   ;;  %v84_v9 = vld [vmem:[%s196_s0 + $0x4] ss:$8 sm:$0xf]  }
   0x4   :  { %14 = vrot.lane.b32.xlu0 %v13_v2, %s99_s14  ;;  %v81_v7 = vld [vmem:[%s196_s0 + $0x6] ss:$8 sm:$0xf0]   ;;  %34 = vrot.lane.b32.xlu1 %v33_v5, %s100_s19  ;;  %v85_v10 = vld [vmem:[%s196_s0 + $0x4] ss:$8 sm:$0xf0]  }
   0x5   :  { %v23_v8 = vsel %vm4_vm0, %v81_v7, %v80_v6  ;;  %v86_v11 = vld [vmem:[%s196_s0 + $0x3] ss:$8 sm:$0xf]   ;;  %v43_v12 = vsel %vm4_vm0, %v85_v10, %v84_v9  ;;  %s101_s28 = smov 96   ;;  %s102_s4 = smov 64   ;;  %vm36_vm4 = vcmask 786048  }
   0x6   :  { %v87_v13 = vld [vmem:[%s196_s0 + $0x3] ss:$8 sm:$0xf0]   ;;  %v88_v14 = vld [vmem:[%s196_s0 + $0x2] ss:$8 sm:$0xf]  }
   0x7   :  { %v89_v15 = vld [vmem:[%s196_s0 + $0x2] ss:$8 sm:$0xf0]   ;;  %v53_v16 = vsel %vm4_vm0, %v87_v13, %v86_v11  ;;  %v90_v17 = vld [vmem:[%s196_s0 + $0x1] ss:$8 sm:$0xf]  }
   0x8   :  { %24 = vrot.lane.b32.xlu0 %v23_v8, %s101_s28  ;;  %44 = vrot.lane.b32.xlu1 %v43_v12, %s102_s4  ;;  %v63_v18 = vsel %vm4_vm0, %v89_v15, %v88_v14  ;;  %v91_v19 = vld [vmem:[%s196_s0 + $0x1] ss:$8 sm:$0xf0]   ;;  %v2_v20 = vld [vmem:[%s196_s0] ss:$8 sm:$0xf]  }
   0x9   :  { %v3_v21 = vld [vmem:[%s196_s0] ss:$8 sm:$0xf0]   ;;  %s103_s0 = smov 48   ;;  %s104_s13 = smov 32   ;;  %v73_v23 = vsel %vm4_vm0, %v91_v19, %v90_v17  ;;  %vm46_vm5 = vcmask 654848  }
   0xa   :  { %v5_v22 = vsel %vm4_vm0, %v3_v21, %v2_v20  ;;  %s105_s16 = smov 16   ;;  %vm56_vm6 = vcmask 523648   ;;  %vm66_vm7 = vcmask 392448   ;;  %vm76_vm8 = vcmask 261248  }
   0xb   :  { %7 = vst.msk [vmem:[%s197_s1] sm:$0xff] %vm6_vm1, %v5_v22  }
   0xc   :  { %54 = vrot.lane.b32.xlu0 %v53_v16, %s103_s0  ;;  %64 = vrot.lane.b32.xlu1 %v63_v18, %s104_s13 }
  0x10   :  { %74 = vrot.lane.b32.xlu0 %v73_v23, %s105_s16 }
  0x76   :  { %v15_v24 = vpop.permute.xlu0 %14   ;;  %v35_v25 = vpop.permute.xlu1 %34  }
  0x77   :  { %17 = vst.msk [vmem:[%s197_s1] sm:$0xff] %vm16_vm2, %v15_v24  }
  0x7a   :  { %v25_v26 = vpop.permute.xlu0 %24   ;;  %v45_v27 = vpop.permute.xlu1 %44  }
  0x7b   :  { %27 = vst.msk [vmem:[%s197_s1] sm:$0xff] %vm26_vm3, %v25_v26  }
  0x7c   :  { %37 = vst.msk [vmem:[%s197_s1] sm:$0xff] %vm36_vm4, %v35_v25  }
  0x7d   :  { %47 = vst.msk [vmem:[%s197_s1] sm:$0xff] %vm46_vm5, %v45_v27  }
  0x7e   :  { %v55_v28 = vpop.permute.xlu0 %54   ;;  %v65_v29 = vpop.permute.xlu1 %64  }
  0x7f   :  { %57 = vst.msk [vmem:[%s197_s1] sm:$0xff] %vm56_vm6, %v55_v28  }
  0x80   :  { %67 = vst.msk [vmem:[%s197_s1] sm:$0xff] %vm66_vm7, %v65_v29  }
  0x82   :  { %v75_v30 = vpop.permute.xlu0 %74  }
  0x83   :  { %77 = vst.msk [vmem:[%s197_s1] sm:$0xff] %vm76_vm8, %v75_v30  }

// kernel: lovasz_softmax_3d_loss.2
= control target key start
LH: loop header
LB: loop body
LE: loop exit
PB: predicated region body
PF: predicated region fallthrough
CT: control target
= control target key end

     0   :  { %s1018_s0 = inlined_call_operand.hbm [shape: f32[2,4,512], index: 0, kind: input, shape index: {}]   ;;  %s1019_s1 = inlined_call_operand.hbm [shape: s32[2,1,512], index: 1, kind: input, shape index: {}]   ;;  %s1020_s2 = inlined_call_operand.hbm [shape: f32[4,1024], index: 2, kind: output, shape index: {}]  }
   0x1   :  { %1025 = sst [smem:[#allocation13_spill]] %s1018_s0 }
   0x2   :  { %7 = vsyncpa [#allocation3], 0 }
   0x3   :  { %9 = vsyncpa [#allocation3 + $0x1], 0 }
   0x4   :  { %10 = vsyncpa [#allocation6], 0 }
   0x5   :  { %12 = vsyncpa [#allocation6 + $0x1], 0 }
   0x6   :  { %13 = vsyncpa [#allocation4], 0 }
   0x7   :  { %15 = vsyncpa [#allocation4 + $0x1], 0  ;;  %s741_s9 = smov 0   ;;  %s743_s10 = smov 0  }
   0x8   :  { %s745_s11 = smov 0   ;;  %s747_s12 = smov 0  }
   0x9   :  { %s749_s13 = smov 0   ;;  %s751_s14 = smov 0  }
   0xa   :  { %s753_s15 = smov 0   ;;  %s755_s16 = smov 0  }
   0xb   :  { %s757_s17 = smov 0   ;;  %s759_s18 = smov 0  }
   0xc   :  { %s761_s19 = smov 0  }
   0xd LB: > { %s395_s20 = sadd.s32 4294967295, %s719_s19   ;;  %s396_s21 = sadd.s32 4294967294, %s719_s19   ;;  %s719_s19 = sphi %s761_s19, %s21_s19   ;;  %s715_s18 = sphi %s759_s18, %s1052_s18   ;;  %s711_s17 = sphi %s757_s17, %s1051_s17   ;;  %s707_s16 = sphi %s755_s16, %s1050_s16   ;;  %s703_s15 = sphi %s753_s15, %s1049_s15   ;;  %s699_s14 = sphi %s751_s14, %s1048_s14   ;;  %s695_s13 = sphi %s749_s13, %s1047_s13   ;;  %s691_s12 = sphi %s747_s12, %s1046_s12   ;;  %s687_s11 = sphi %s745_s11, %s1045_s11   ;;  %s683_s10 = sphi %s743_s10, %s1044_s10   ;;  %s679_s9 = sphi %s741_s9, %s1043_s9  }
   0xe   : > { %s30_s22 = sadd.s32 1, %s711_s17  ;;  %s33_s23 = sadd.s32 1, %s715_s18 }
   0xf   : > { %p31_p0 = scmp.ge.s32.totalorder %s30_s22, 2  ;;  %s42_s24 = sadd.s32 1, %s699_s14 }
  0x10   : > { %p49_p1 = scmp.ne.s32.totalorder %s699_s14, %s695_s13  ;;  %p50_p2 = scmp.eq.s32.totalorder %s719_s19, 0 }
  0x11   : > { %s1054_s22 = smov (%p31_p0, %s30_s22), 0  ;;  %s1056_s23 = smov (!%p31_p0, %s33_s23), %s715_s18 }
  0x12   : > { %1026 = sst [smem:[#allocation11_spill]] %s1054_s22  ;;  %s38_s25 = ssub.s32 %s711_s17, %s1054_s22 }
  0x13   : > { %p807_p3 = por %p50_p2, %p49_p1  ;;  %p35_p4 = scmp.ge.s32.totalorder %s1056_s23, 2 }
  0x14   : > { %p55_p5 = scmp.ne.s32.totalorder %s695_s13, %s691_s12  ;;  %p56_p6 = scmp.eq.s32.totalorder %s395_s20, 0 }
  0x15   : > { %s397_s27 = sshll.u32 %s715_s18, 1  ;;  %s1058_s23 = smov (%p35_p4, %s1056_s23), 0 }
  0x16   : > { %1028 = sst [smem:[#allocation12_spill]] %s1058_s23  ;;  %p817_p7 = por %p56_p6, %p55_p5 }
  0x17   : > { %s94_s29 = sadd.s32 %s711_s17, %s397_s27  ;;  %s37_s30 = ssub.s32 %s715_s18, %s1058_s23 }
  0x18   : > { %s1029_s28 = scalar_select %p817_p7, 1, 0 }
  0x19   : > { %s398_s3 = sshll.u32 %s1058_s23, 1  ;;  %s39_s4 = sor.u32 %s38_s25, %s37_s30 }
  0x1a   : > { %s96_s5 = sadd.s32 %s398_s3, %s1054_s22  ;;  %p40_p8 = scmp.eq.s32.totalorder %s39_s4, 0 }
  0x1b   : > { %s97_s6 = ssub.s32 %s94_s29, %s96_s5  ;;  %s100_s7 = sadd.s32 1, %s687_s11 }
  0x1c   : > { %p98_p9 = scmp.eq.s32.totalorder %s97_s6, 0  ;;  %p110_p10 = scmp.ne.s32.totalorder %s687_s11, %s683_s10 }
  0x1d   : > { %s828_s8 = scalar_select %p40_p8, %s699_s14, %s42_s24  }
  0x1e   : > { %s831_s12 = scalar_select %p98_p9, %s687_s11, %s100_s7  }
  0x1f   : > { %p111_p11 = scmp.eq.s32.totalorder %s395_s20, 3  ;;  %p116_p12 = scmp.ne.s32.totalorder %s683_s10, %s679_s9 }
  0x20   : > { %p117_p13 = scmp.eq.s32.totalorder %s396_s21, 3  ;;  %p439_p2 = scmp.lt.s32.totalorder %s719_s19, 4 }
  0x21   : > { %p841_p0 = por %p111_p11, %p110_p10  ;;  %s851_s24 = sand.u32 1, %s699_s14  }
  0x22   : > { %p845_p1 = por %p117_p13, %p116_p12  ;;  %s402_s20 = sshll.u32 %s711_s17, 1 }
  0x23   : > { %s1030_s25 = scalar_select %p841_p0, 1, 0 }
  0x24   : > { %s1031_s27 = scalar_select %p845_p1, 1, 0 }
  0x25   : > { %s401_s29 = sshll.u32 %s851_s24, 3  ;;  %s403_s30 = sshll.u32 %s715_s18, 2 }
  0x26   : > { %s856_s3 = sadd.s32 %s403_s30, %s402_s20  ;;  %s141_s21 = scalar_lea.vmem [#allocation2], %s401_s29 }
  0x27   : > { %s151_s4 = sshll.u32 %s141_s21, 4  ;;  %s404_s5 = sshll.u32 %s856_s3, 6  ;;  %s859_s4 = int_to_ptr.vmem [resolvable:$true] %s151_s4 }
  0x28   : > { %s1032_s0 = sld [smem:[#allocation13_spill]]  ;;  %p868_p4 = pnand %p439_p2, %p807_p3 }
  0x29   : > { %s138_s20 = scalar_lea.sflag [#allocation3], %s851_s24 }
  0x2a   : > { %p535_p9 = pneg %p868_p4 }
  0x2e   : > { %s864_s23 = scalar_lea.hbm %s1032_s0, %s404_s5  ;;  %s538_s21 = scalar_lea.hbm %s1032_s0, 512 }
  0x2f   : > { %s533_s29 = scalar_lea.hbm %s864_s23, 128  ;;  %p539_p3 = scmp.lt.u32.totalorder %s864_s23, %s1032_s0 }
  0x30   : > { %p534_p8 = scmp.ne.s32.totalorder %s864_s23, %s533_s29  ;;  %p540_p12 = scmp.lt.u32.totalorder %s538_s21, %s533_s29 }
  0x31   : > { %p542_p2 = scmp.lt.u32.totalorder %s533_s29, %s864_s23 }
  0x32   : > { %p536_p10 = pnand %p535_p9, %p534_p8  ;;  %p541_p13 = por %p540_p12, %p539_p3 }
  0x34   : > { %p537_p11 = pneg %p536_p10  ;;  %p543_p5 = por %p542_p2, %p541_p13 }
  0x36   : > { %p544_p6 = pnand %p543_p5, %p537_p11 }
  0x38   : > { %547 = shalt.err (!%p544_p6)
}
  0x39   : > { %s548_s7 = scalar_lea.vmem %s859_s4, 128  ;;  %s721_s26 = smov [#allocation2]  }
  0x3a   : > { %p549_p8 = scmp.ne.s32.totalorder %s859_s4, %s548_s7  ;;  %s553_s30 = sshll.u32 %s721_s26, 4  ;;  %s554_s30 = int_to_ptr.vmem [resolvable:$false] %s553_s30 }
  0x3b   : > { %s555_s5 = scalar_lea.vmem %s554_s30, 256  ;;  %p556_p0 = scmp.lt.s32.totalorder %s859_s4, %s554_s30 }
  0x3c   : > { %p551_p10 = pnand %p549_p8, %p535_p9  ;;  %p557_p3 = scmp.lt.s32.totalorder %s555_s5, %s548_s7 }
  0x3e   : > { %p552_p1 = pneg %p551_p10  ;;  %p558_p12 = por %p557_p3, %p556_p0 }
  0x40   : > { %p559_p13 = pnand %p558_p12, %p552_p1 }
  0x42   : > { %562 = shalt.err (!%p559_p13)
}
  0x43   : > { %431 = dma.hbm_to_vmem [thread:$0]  (!%p868_p4), %s864_s23, 128, %s859_s4, %s138_s20  }
  0x44   : > { %p1034_p5 = scmp.lt.s32.totalorder %s719_s19, 5  ;;  %p1035_p6 = scmp.ge.s32.totalorder %s719_s19, 1 }
  0x45   : > { %s405_s21 = sshll.u32 %s851_s24, 1  ;;  %s408_s6 = sshll.u32 %s856_s3, 4 }
  0x46   : > { %p904_p11 = pnand %p1035_p6, %p1034_p5  ;;  %s913_s30 = scalar_lea.hbm %s1019_s1, %s408_s6 }
  0x47   : > { %s162_s5 = scalar_lea.vmem [#allocation5], %s405_s21  ;;  %s159_s23 = scalar_lea.sflag [#allocation6], %s851_s24 }
  0x48   : > { %s1036_s29 = scalar_select %p904_p11, 1, 0 }
  0x49   : > { %s172_s0 = sshll.u32 %s162_s5, 4  ;;  %s563_s4 = scalar_lea.hbm %s913_s30, 32  ;;  %s173_s0 = int_to_ptr.vmem [resolvable:$true] %s172_s0 }
  0x4a   : > { %p564_p0 = scmp.ne.s32.totalorder %s913_s30, %s563_s4  ;;  %s568_s7 = scalar_lea.hbm %s1019_s1, 128 }
  0x4b   : > { %p569_p8 = scmp.lt.u32.totalorder %s913_s30, %s1019_s1  ;;  %p570_p10 = scmp.lt.u32.totalorder %s568_s7, %s563_s4 }
  0x4c   : > { %p566_p1 = pnand %p564_p0, %p535_p9  ;;  %p572_p12 = scmp.lt.u32.totalorder %s563_s4, %s913_s30 }
  0x4d   : > { %p571_p3 = por %p570_p10, %p569_p8 }
  0x4e   : > { %p567_p2 = pneg %p566_p1 }
  0x4f   : > { %p573_p13 = por %p572_p12, %p571_p3 }
  0x51   : > { %p574_p5 = pnand %p573_p13, %p567_p2 }
  0x53   : > { %577 = shalt.err (!%p574_p5)
}
  0x54   : > { %s578_s24 = scalar_lea.vmem %s173_s0, 32  ;;  %s722_s21 = smov [#allocation5]  }
  0x55   : > { %p579_p6 = scmp.ne.s32.totalorder %s173_s0, %s578_s24  ;;  %s583_s5 = sshll.u32 %s722_s21, 4  ;;  %s584_s5 = int_to_ptr.vmem [resolvable:$false] %s583_s5 }
  0x56   : > { %s585_s3 = scalar_lea.vmem %s584_s5, 64  ;;  %p586_p7 = scmp.lt.s32.totalorder %s173_s0, %s584_s5 }
  0x57   : > { %p581_p0 = pnand %p579_p6, %p535_p9  ;;  %p587_p11 = scmp.lt.s32.totalorder %s585_s3, %s578_s24 }
  0x59   : > { %p582_p1 = pneg %p581_p0  ;;  %p588_p8 = por %p587_p11, %p586_p7 }
  0x5b   : > { %p589_p10 = pnand %p588_p8, %p582_p1 }
  0x5d   : > { %592 = shalt.err (!%p589_p10)
}
  0x5e   : > { %434 = dma.hbm_to_vmem [thread:$0]  (!%p868_p4), %s913_s30, 32, %s173_s0, %s159_s23  }
  0x5f   : > { %p1037_p2 = scmp.ne.s32.totalorder %s1036_s29, 0 }
  0x60   : > { %s183_s4 = sand.u32 (!%p1037_p2), 1, %s695_s13   ;;  %p1038_p9 = scmp.ne.s32.totalorder (!%p1037_p2), %s1029_s28, 0 }
  0x61   : > { %181 = sbr.rel (%p1037_p2) target bundleno = 152 (0x98), region = 28  ;;  %s410_s20 = sshll.u32 (!%p1037_p2), %s183_s4, 3 }
  0x62   : > { %s184_s7 = scalar_lea.sflag (!%p1037_p2), [#allocation3], %s183_s4  ;;  %s187_s6 = scalar_lea.vmem (!%p1037_p2), [#allocation2], %s410_s20 }
  0x68   : > { %666 = dma.done.wait (%p1038_p9), %s184_s7, 128  }
  0x69   : > { %668 = vsyncadd (%p1038_p9), %s184_s7, 4294967168  ;;  %s411_s26 = sshll.u32 %s183_s4, 1  ;;  %s193_s24 = scalar_lea.sflag [#allocation6], %s183_s4 }
  0x6a   : > { %s196_s22 = scalar_lea.vmem [#allocation5], %s411_s26 }
  0x6b   : > { %670 = dma.done.wait (%p1038_p9), %s193_s24, 32  }
  0x6c   : > { %672 = vsyncadd (%p1038_p9), %s193_s24, 4294967264  ;;  %v229_v0 = vlaneseq  ;;  %v227_v2 = vld [vmem:[%s187_s6] sm:$0xff]  ;;  %v228_v5 = vld [vmem:[%s196_s22] sm:$0x3]  ;;  %v723_v10 = vmov 0.0   ;;  %s219_s0 = sand.u32 1, %s683_s10  }
  0x6d   : > { %v241_v3 = vmin.f32 %v227_v2, 80.0  ;;  %s412_s28 = sshll.u32 %s219_s0, 3  ;;  %s416_s29 = sshll.u32 %s707_s16, 1  ;;  %v724_v20 = vmov 0  }
  0x6e   : > { %v230_v1 = vshrl.u32 %v229_v0, 7  ;;  %s275_s30 = sadd.s32 %s703_s15, %s416_s29  ;;  %s221_s23 = scalar_lea.vmem [#allocation7], %s412_s28 }
  0x6f   : > { %v242_v6 = vmul.f32 1.442695, %v241_v3  ;;  %s283_s21 = sshll.u32 %s221_s23, 4  ;;  %s421_s5 = sshll.u32 %s275_s30, 7  ;;  %s953_s21 = int_to_ptr.vmem [resolvable:$true] %s283_s21 }
  0x70   : > { %v233_v4 = vsub.s32 0, %v230_v1  ;;  %v237_v7 = vsub.s32 1, %v230_v1  ;;  %s958_s4 = scalar_lea.hbm %s1020_s2, %s421_s5  ;;  %s267_s15 = scalar_lea.sflag [#allocation4], %s219_s0 }
  0x71   : > { %531 = vpow2.f32 %v242_v6  ;;  %s593_s20 = scalar_lea.vmem %s953_s21, 128  ;;  %p1039_p4 = scmp.ne.s32.totalorder %s1030_s25, 0 }
  0x72   : > { %v234_v8 = vrot.slane %v228_v5, %v233_v4  ;;  %v238_v9 = vrot.slane %v228_v5, %v237_v7  ;;  %p594_p7 = scmp.ne.s32.totalorder %s953_s21, %s593_s20  ;;  %s725_s7 = smov [#allocation7]  }
  0x73   : > { %s597_s6 = sshll.u32 %s725_s7, 4  ;;  %s598_s6 = int_to_ptr.vmem [resolvable:$false] %s597_s6 }
  0x74   : > { %vm239_vm0 = vcmp.eq.s32.totalorder %v234_v8, %v230_v1  ;;  %vm240_vm1 = vcmp.eq.s32.totalorder %v238_v9, %v230_v1  ;;  %p595_p11 = pnand %p594_p7, %p1039_p4  ;;  %s599_s26 = scalar_lea.vmem %s598_s6, 256 }
  0x75   : > { %v413_v11 = vsel %vm239_vm0, 1.0, %v723_v10  ;;  %v414_v13 = vsel %vm240_vm1, 1.0, %v723_v10  ;;  %v244_v21 = vsel %vm239_vm0, 1, %v724_v20  ;;  %v245_v24 = vsel %vm240_vm1, 1, %v724_v20  ;;  %p600_p12 = scmp.lt.s32.totalorder %s953_s21, %s598_s6  ;;  %p601_p13 = scmp.lt.s32.totalorder %s599_s26, %s593_s20 }
  0x76   : > { %p596_p3 = pneg %p595_p11 }
  0x77   : > { %p602_p5 = por %p601_p13, %p600_p12 }
  0x79   : > { %p603_p6 = pnand %p602_p5, %p596_p3 }
  0x7b   : > { %v532_v12 = vpop.eup %531 }
  0x7c   : > { %v249_v14 = vcombine.high %v532_v12, %v532_v12  ;;  %v251_v15 = vsub.f32 %v413_v11, %v532_v12 }
  0x7e   : > { %v252_v16 = vsub.f32 %v414_v13, %v249_v14  ;;  %v253_v17 = vand.u32 2147483647, %v251_v15 }
  0x80   : > { %v254_v18 = vand.u32 2147483647, %v252_v16  ;;  %v255_v19 = vsub.f32 0.0, %v253_v17 }
  0x82   : > { %v256_v22 = vsub.f32 0.0, %v254_v18  ;;  %v259_v23 = vand.u32 4294967294, %v255_v19 }
  0x84   : > { %v260_v25 = vand.u32 4294967294, %v256_v22  ;;  %v261_v26 = vor.u32 %v259_v23, %v244_v21 }
  0x86   : > { %v262_v27 = vor.u32 %v260_v25, %v245_v24 }
  0x88   : > { %v263_v28 = vcombine.low %v261_v26, %v262_v27 }
  0x8a   : > { %265 = vst [vmem:[%s221_s23] sm:$0xff] %v263_v28 }
  0x8b   : > { %606 = shalt.err (!%p603_p6)
}
  0x8c   : > { %s607_s24 = scalar_lea.hbm %s958_s4, 128  ;;  %s611_s28 = scalar_lea.hbm %s1020_s2, 512 }
  0x8d   : > { %p608_p0 = scmp.ne.s32.totalorder %s958_s4, %s607_s24  ;;  %p612_p10 = scmp.lt.u32.totalorder %s958_s4, %s1020_s2 }
  0x8e   : > { %p613_p2 = scmp.lt.u32.totalorder %s611_s28, %s607_s24  ;;  %p615_p7 = scmp.lt.u32.totalorder %s607_s24, %s958_s4 }
  0x8f   : > { %p609_p1 = pnand %p608_p0, %p1039_p4 }
  0x90   : > { %p614_p9 = por %p613_p2, %p612_p10 }
  0x91   : > { %p610_p8 = pneg %p609_p1 }
  0x92   : > { %p616_p11 = por %p615_p7, %p614_p9 }
  0x94   : > { %p617_p3 = pnand %p616_p11, %p610_p8 }
  0x96   : > { %620 = shalt.err (!%p617_p3)
}
  0x97   : > { %426 = dma.vmem_to_hbm [thread:$0]  (%p1039_p4), %s953_s21, 128, %s958_s4, %s267_s15  }
  0x98 PF: > { %p440_p12 = scmp.ge.s32.totalorder %s719_s19, 2  ;;  %s295_s23 = sand.u32 1, %s679_s9  }
  0x99   : > { %p1040_p13 = scmp.ne.s32.totalorder %s1031_s27, 0  ;;  %s296_s5 = scalar_lea.sflag [#allocation4], %s295_s23 }
  0x9b   : > { %p436_p5 = pnand %p440_p12, %p1040_p13 }
  0x9d   : > { %674 = dma.done.wait (!%p436_p5), %s296_s5, 128  }
  0x9e   : > { %676 = vsyncadd (!%p436_p5), %s296_s5, 4294967168  ;;  %s21_s19 = sadd.s32 1, %s719_s19   ;;  %s1041_s25 = sld [smem:[#allocation11_spill]] }
  0x9f   : > { %p18_p6 = scmp.ge.s32.totalorder %s21_s19, 6   ;;  %s1042_s21 = sld [smem:[#allocation12_spill]] }
  0xa0   : > { %s1043_s9 = smov %s683_s10  ;;  %s1044_s10 = smov %s687_s11 }
  0xa1   : > { %s1045_s11 = smov %s831_s12  ;;  %s1046_s12 = smov %s695_s13 }
  0xa2   : > { %s1047_s13 = smov %s699_s14  ;;  %s1048_s14 = smov %s828_s8 }
  0xa3   : > { %s1049_s15 = smov %s711_s17  ;;  %s1050_s16 = smov %s715_s18 }
  0xa4   : > { %s1051_s17 = smov %s1041_s25  ;;  %20 = sbr.rel (!%p18_p6) target bundleno = 13 (0xd), region = 86 }
  0xa5   : > { %s1052_s18 = smov %s1042_s21 }
  0xab   :  { %301 = vsyncpa [#allocation3], 1 }
  0xac   :  { %303 = vsyncpa [#allocation3 + $0x1], 1 }
  0xad   :  { %304 = vsyncpa [#allocation6], 1 }
  0xae   :  { %306 = vsyncpa [#allocation6 + $0x1], 1 }
  0xaf   :  { %307 = vsyncpa [#allocation4], 1 }
  0xb0   :  { %309 = vsyncpa [#allocation4 + $0x1], 1 }

// kernel: lovasz_softmax_3d_loss.3
= control target key start
LH: loop header
LB: loop body
LE: loop exit
PB: predicated region body
PF: predicated region fallthrough
CT: control target
= control target key end

     0   :  { %s1506_s0 = inlined_call_operand.hbm [shape: f32[2,2,1], index: 0, kind: input, shape index: {}]   ;;  %s1507_s1 = inlined_call_operand.hbm [shape: f32[2,2,1024], index: 1, kind: input, shape index: {}]   ;;  %s1508_s2 = inlined_call_operand.hbm [shape: f32[2,2,1], index: 2, kind: output, shape index: {}]  }
   0x1   :  { %1521 = sst [smem:[#allocation19_spill]] %s1506_s0 }
   0x2   :  { %1522 = sst [smem:[#allocation20_spill]] %s1508_s2 }
   0x3   :  { %7 = vsyncpa [#allocation5], 0 }
   0x4   :  { %9 = vsyncpa [#allocation5 + $0x1], 0 }
   0x5   :  { %10 = vsyncpa [#allocation8], 0 }
   0x6   :  { %12 = vsyncpa [#allocation8 + $0x1], 0 }
   0x7   :  { %13 = vsyncpa [#allocation6], 0 }
   0x8   :  { %15 = vsyncpa [#allocation6 + $0x1], 0  ;;  %s1128_s9 = smov 0   ;;  %s1130_s10 = smov 0  }
   0x9   :  { %s1132_s11 = smov 0   ;;  %s1134_s12 = smov 0  }
   0xa   :  { %s1136_s13 = smov 0   ;;  %s1138_s14 = smov 0  }
   0xb   :  { %s1140_s15 = smov 0   ;;  %s1142_s16 = smov 0  }
   0xc   :  { %s1144_s17 = smov 0   ;;  %s1146_s18 = smov 0  }
   0xd   :  { %s1148_s19 = smov 0  }
   0xe LB: > { %1523 = sst [smem:[#allocation13_spill]] %s1070_s12  ;;  %s751_s20 = sadd.s32 4294967295, %s1098_s19   ;;  %s1098_s19 = sphi %s1148_s19, %s21_s19   ;;  %s1094_s18 = sphi %s1146_s18, %s1563_s18   ;;  %s1090_s17 = sphi %s1144_s17, %s1555_s17   ;;  %s1086_s16 = sphi %s1142_s16, %s1562_s16   ;;  %s1082_s15 = sphi %s1140_s15, %s1554_s15   ;;  %s1078_s14 = sphi %s1138_s14, %s1561_s14   ;;  %s1074_s13 = sphi %s1136_s13, %s1560_s13   ;;  %s1070_s12 = sphi %s1134_s12, %s1559_s12   ;;  %s1066_s11 = sphi %s1132_s11, %s1558_s11   ;;  %s1062_s10 = sphi %s1130_s10, %s1557_s10   ;;  %s1058_s9 = sphi %s1128_s9, %s1556_s9  }
   0xf   : > { %1524 = sst [smem:[#allocation14_spill]] %s1086_s16  ;;  %s752_s21 = sadd.s32 4294967294, %s1098_s19  }
  0x10   : > { %1525 = sst [smem:[#allocation15_spill]] %s1090_s17  ;;  %s33_s22 = sadd.s32 1, %s1094_s18 }
  0x11   : > { %s40_s23 = sadd.s32 1, %s1078_s14  ;;  %p47_p0 = scmp.ne.s32.totalorder %s1078_s14, %s1074_s13 }
  0x12   : > { %p1510_p1 = scmp.eq.s32.totalorder %s1098_s19, 0  ;;  %p53_p2 = scmp.ne.s32.totalorder %s1074_s13, %s1070_s12 }
  0x13   : > { %p1192_p3 = scmp.eq.s32.totalorder %s751_s20, 0  ;;  %p105_p5 = scmp.eq.s32.totalorder %s751_s20, 3 }
  0x14   : > { %p1198_p4 = por %p1510_p1, %p47_p0  ;;  %p111_p7 = scmp.eq.s32.totalorder %s752_s21, 3 }
  0x15   : > { %p1204_p6 = por %p1192_p3, %p53_p2  ;;  %p1208_p8 = por %p105_p5, %p47_p0 }
  0x16   : > { %p1212_p9 = por %p111_p7, %p53_p2  ;;  %p1509_p10 = scmp.lt.s32.totalorder %s1098_s19, 4 }
  0x17   : > { %s1528_s26 = scalar_select %p1204_p6, 1, 0 }
  0x18   : > { %s1529_s27 = scalar_select %p1208_p8, 1, 0 }
  0x19   : > { %s1531_s28 = scalar_select %p1212_p9, 1, 0 }
  0x1a   : > { %1530 = sst [smem:[#allocation16_spill]] %s1529_s27  ;;  %s131_s29 = sand.u32 1, %s1078_s14  }
  0x1b   : > { %1532 = sst [smem:[#allocation17_spill]] %s1531_s28  ;;  %s756_s30 = sshll.u32 %s1094_s18, 5 }
  0x1c   : > { %s755_s3 = sshll.u32 %s131_s29, 1  ;;  %s1533_s0 = sld [smem:[#allocation19_spill]] }
  0x1d   : > { %s135_s7 = scalar_lea.vmem [#allocation4], %s755_s3  ;;  %p1228_p11 = pnand %p1509_p10, %p1198_p4 }
  0x1e   : > { %s142_s8 = sshll.u32 %s135_s7, 4  ;;  %s132_s21 = scalar_lea.sflag [#allocation5], %s131_s29  ;;  %s1232_s8 = int_to_ptr.vmem [resolvable:$true] %s142_s8 }
  0x1f   : > { %p914_p2 = pneg %p1228_p11 }
  0x22   : > { %s1222_s6 = scalar_lea.hbm %s1533_s0, %s756_s30  ;;  %s917_s4 = scalar_lea.hbm %s1533_s0, 64 }
  0x23   : > { %s912_s30 = scalar_lea.hbm %s1222_s6, 32  ;;  %p918_p4 = scmp.lt.u32.totalorder %s1222_s6, %s1533_s0 }
  0x24   : > { %p913_p0 = scmp.ne.s32.totalorder %s1222_s6, %s912_s30  ;;  %p919_p10 = scmp.lt.u32.totalorder %s917_s4, %s912_s30 }
  0x25   : > { %p921_p12 = scmp.lt.u32.totalorder %s912_s30, %s1222_s6 }
  0x26   : > { %p915_p5 = pnand %p914_p2, %p913_p0  ;;  %p920_p1 = por %p919_p10, %p918_p4 }
  0x28   : > { %p916_p7 = pneg %p915_p5  ;;  %p922_p13 = por %p921_p12, %p920_p1 }
  0x2a   : > { %p923_p9 = pnand %p922_p13, %p916_p7 }
  0x2c   : > { %926 = shalt.err (!%p923_p9)
}
  0x2d   : > { %s927_s29 = scalar_lea.vmem %s1232_s8, 32  ;;  %s1100_s25 = smov [#allocation4]  }
  0x2e   : > { %p928_p0 = scmp.ne.s32.totalorder %s1232_s8, %s927_s29  ;;  %s932_s3 = sshll.u32 %s1100_s25, 4  ;;  %s933_s3 = int_to_ptr.vmem [resolvable:$false] %s932_s3 }
  0x2f   : > { %s934_s5 = scalar_lea.vmem %s933_s3, 64  ;;  %p935_p6 = scmp.lt.s32.totalorder %s1232_s8, %s933_s3 }
  0x30   : > { %p930_p5 = pnand %p928_p0, %p914_p2  ;;  %p936_p10 = scmp.lt.s32.totalorder %s934_s5, %s927_s29 }
  0x32   : > { %p931_p8 = pneg %p930_p5  ;;  %p937_p4 = por %p936_p10, %p935_p6 }
  0x34   : > { %p938_p1 = pnand %p937_p4, %p931_p8 }
  0x36   : > { %941 = shalt.err (!%p938_p1)
}
  0x37   : > { %785 = dma.hbm_to_vmem [thread:$0]  (!%p1228_p11), %s1222_s6, 32, %s1232_s8, %s132_s21  }
  0x38   : > { %p1535_p6 = scmp.lt.s32.totalorder %s1098_s19, 5  ;;  %p1536_p8 = scmp.ge.s32.totalorder %s1098_s19, 1 }
  0x39   : > { %s30_s30 = sadd.s32 1, %s1090_s17  ;;  %s68_s4 = sadd.s32 1, %s1066_s11 }
  0x3a   : > { %p1265_p9 = pnand %p1536_p8, %p1535_p6  ;;  %p31_p12 = scmp.ge.s32.totalorder %s30_s30, 2 }
  0x3b   : > { %p75_p13 = scmp.ne.s32.totalorder %s1066_s11, %s1062_s10  ;;  %p81_p2 = scmp.ne.s32.totalorder %s1062_s10, %s1058_s9 }
  0x3c   : > { %s1565_s30 = smov (%p31_p12, %s30_s30), 0  ;;  %s1567_s22 = smov (!%p31_p12, %s33_s22), %s1094_s18 }
  0x3d   : > { %1538 = sst [smem:[#allocation18_spill]] %s1565_s30  ;;  %s64_s6 = ssub.s32 %s1090_s17, %s1565_s30 }
  0x3e   : > { %p1539_p11 = scmp.eq.s32.totalorder %s1098_s19, 0  ;;  %p35_p0 = scmp.ge.s32.totalorder %s1567_s22, 2 }
  0x3f   : > { %p1290_p5 = por %p81_p2, %p1192_p3  ;;  %s149_s9 = sand.u32 1, %s1066_s11  }
  0x40   : > { %p1284_p7 = por %p75_p13, %p1539_p11  ;;  %s758_s7 = sshll.u32 %s1090_s17, 2 }
  0x41   : > { %s1541_s21 = scalar_select %p1290_p5, 1, 0 }
  0x42   : > { %s1569_s22 = smov (%p35_p0, %s1567_s22), 0  ;;  %s757_s29 = sshll.u32 %s149_s9, 3 }
  0x43   : > { %s37_s25 = ssub.s32 %s1094_s18, %s1569_s22  ;;  %s759_s5 = sshll.u32 %s1094_s18, 3 }
  0x44   : > { %p38_p10 = scmp.eq.s32.totalorder %s37_s25, 0  ;;  %s65_s3 = sor.u32 %s64_s6, %s37_s25 }
  0x45   : > { %p66_p4 = scmp.eq.s32.totalorder %s65_s3, 0  ;;  %s159_s30 = sadd.s32 %s759_s5, %s758_s7 }
  0x46   : > { %s1304_s0 = scalar_select %p38_p10, %s1078_s14, %s40_s23  }
  0x47   : > { %s1307_s24 = scalar_select %p66_p4, %s1066_s11, %s68_s4  }
  0x48   : > { %s153_s28 = scalar_lea.vmem [#allocation7], %s757_s29  ;;  %s760_s17 = sshll.u32 %s159_s30, 5 }
  0x49   : > { %s163_s12 = sshll.u32 %s153_s28, 4  ;;  %s1314_s16 = scalar_lea.hbm %s1507_s1, %s760_s17  ;;  %s1309_s12 = int_to_ptr.vmem [resolvable:$true] %s163_s12 }
  0x4a   : > { %p1542_p3 = scmp.lt.s32.totalorder %s1098_s19, 4  ;;  %s150_s28 = scalar_lea.sflag [#allocation8], %s149_s9 }
  0x4b   : > { %s942_s30 = scalar_lea.hbm %s1314_s16, 128  ;;  %s947_s27 = scalar_lea.hbm %s1507_s1, 512 }
  0x4c   : > { %p1320_p1 = pnand %p1542_p3, %p1284_p7  ;;  %p943_p6 = scmp.ne.s32.totalorder %s1314_s16, %s942_s30 }
  0x4d   : > { %p948_p2 = scmp.lt.u32.totalorder %s1314_s16, %s1507_s1  ;;  %p949_p11 = scmp.lt.u32.totalorder %s947_s27, %s942_s30 }
  0x4e   : > { %p944_p8 = pneg %p1320_p1  ;;  %p951_p0 = scmp.lt.u32.totalorder %s942_s30, %s1314_s16 }
  0x4f   : > { %p950_p7 = por %p949_p11, %p948_p2 }
  0x50   : > { %p945_p12 = pnand %p944_p8, %p943_p6 }
  0x51   : > { %p952_p10 = por %p951_p0, %p950_p7 }
  0x52   : > { %p946_p13 = pneg %p945_p12 }
  0x54   : > { %p953_p4 = pnand %p952_p10, %p946_p13 }
  0x56   : > { %956 = shalt.err (!%p953_p4)
}
  0x57   : > { %s957_s8 = scalar_lea.vmem %s1309_s12, 128  ;;  %s1101_s9 = smov [#allocation7]  }
  0x58   : > { %p958_p3 = scmp.ne.s32.totalorder %s1309_s12, %s957_s8  ;;  %s962_s7 = sshll.u32 %s1101_s9, 4  ;;  %s963_s7 = int_to_ptr.vmem [resolvable:$false] %s962_s7 }
  0x59   : > { %s964_s29 = scalar_lea.vmem %s963_s7, 256  ;;  %p965_p5 = scmp.lt.s32.totalorder %s1309_s12, %s963_s7 }
  0x5a   : > { %p960_p6 = pnand %p958_p3, %p944_p8  ;;  %p966_p2 = scmp.lt.s32.totalorder %s964_s29, %s957_s8 }
  0x5c   : > { %p961_p12 = pneg %p960_p6  ;;  %p967_p11 = por %p966_p2, %p965_p5 }
  0x5e   : > { %p968_p7 = pnand %p967_p11, %p961_p12 }
  0x60   : > { %971 = shalt.err (!%p968_p7)
}
  0x61   : > { %788 = dma.hbm_to_vmem [thread:$0]  (!%p1320_p1), %s1314_s16, 128, %s1309_s12, %s150_s28  }
  0x62   : > { %172 = sbr.rel (%p1265_p9) target bundleno = 1232 (0x4d0), region = 28  ;;  %s1352_s25 = sand.u32 (!%p1265_p9), 1, %s1074_s13  }
  0x63   : > { %s762_s3 = sshll.u32 (!%p1265_p9), %s1352_s25, 1  ;;  %s175_s5 = scalar_lea.sflag (!%p1265_p9), [#allocation5], %s1352_s25 }
  0x64   : > { %s1356_s30 = scalar_lea.vmem (!%p1265_p9), [#allocation4], %s762_s3  ;;  %p1544_p5 = scmp.ne.s32.totalorder (!%p1265_p9), %s1528_s26, 0 }
  0x69   : > { %1045 = dma.done.wait (%p1544_p5), %s175_s5, 32  }
  0x6a   : > { %1047 = vsyncadd (%p1544_p5), %s175_s5, 4294967264  ;;  %s183_s12 = sand.u32 1, %s1062_s10   ;;  %p1545_p9 = scmp.ne.s32.totalorder %s1541_s21, 0 }
  0x6b   : > { %s763_s16 = sshll.u32 %s183_s12, 3  ;;  %s184_s20 = scalar_lea.sflag [#allocation8], %s183_s12 }
  0x6c   : > { %s187_s23 = scalar_lea.vmem [#allocation7], %s763_s16 }
  0x6d   : > { %1049 = dma.done.wait (%p1545_p9), %s184_s20, 128  }
  0x6e   : > { %1051 = vsyncadd (%p1545_p9), %s184_s20, 4294967168  ;;  %s1367_s28 = scalar_lea.vmem [#allocation9], %s762_s3  ;;  %p765_p1 = scmp.ne.s32.totalorder %s1082_s15, 0 }
  0x6f   : > { %vm218_vm0 = vcmask (!%p765_p1), 1024   ;;  %v1102_v0 = vmov (!%p765_p1), 0.0  }
  0x70   : > { %217 = sbr.rel (%p765_p1) target bundleno = 119 (0x77), region = 40  ;;  %219 = vst.msk [vmem:[#allocation2] sm:$0x3] (!%p765_p1), %vm218_vm0, %v1102_v0  ;;  %220 = vst.msk [vmem:[#allocation3] sm:$0x3] (!%p765_p1), %vm218_vm0, %v1102_v0 }
  0x77 PF: > { %v1370_v1 = vld [vmem:[%s187_s23] sm:$0xff]  ;;  %v228_v2 = vlaneseq  ;;  %v1103_v3 = vmov 1983009808   ;;  %s1104_s26 = smov 1   ;;  %s1105_s21 = smov 2   ;;  %vm599_vm13 = vcmask 1041408  }
  0x78   : > { %v226_v4 = vunpack.c.l.s4 %v1103_v3  ;;  %v224_v7 = vcombine.high %v1370_v1, %v1370_v1  ;;  %s1106_s2 = smov 4   ;;  %s1107_s17 = smov 8  }
  0x79   : > { %v229_v5 = vshrl.u32 %v228_v2, 7  ;;  %v1391_v41 = vand.u32 127, %v228_v2  ;;  %s1108_s27 = smov 16   ;;  %s1110_s4 = smov 32  }
  0x7a   : > { %v227_v6 = vunpack.c.0.s8 %v226_v4  ;;  %s1111_s6 = smov 64   ;;  %s766_s8 = sshll.u32 %s1082_s15, 9 }
  0x7b   : > { %vm287_vm1 = vcmp.lt.s32.totalorder %v1391_v41, 1  ;;  %vm275_vm2 = vcmp.ge.s32.totalorder %v1391_v41, 1  ;;  %vm312_vm3 = vcmp.lt.s32.totalorder %v1391_v41, 2  ;;  %vm300_vm4 = vcmp.ge.s32.totalorder %v1391_v41, 2  ;;  %s485_s9 = sadd.s32 1, %s766_s8  ;;  %p771_p8 = scmp.ne.s32.totalorder %s1082_s15, 1 }
  0x7c   : > { %v1374_v8 = vsub.s32 %v227_v6, %v229_v5  ;;  %vm337_vm5 = vcmp.lt.s32.totalorder %v1391_v41, 4  ;;  %vm325_vm6 = vcmp.ge.s32.totalorder %v1391_v41, 4  ;;  %vm362_vm7 = vcmp.lt.s32.totalorder %v1391_v41, 8  ;;  %s486_s7 = scvt.s32.f32 %s485_s9 }
  0x7d   : > { %vm350_vm8 = vcmp.ge.s32.totalorder %v1391_v41, 8  ;;  %vm387_vm9 = vcmp.lt.s32.totalorder %v1391_v41, 16  ;;  %vm375_vm10 = vcmp.ge.s32.totalorder %v1391_v41, 16  ;;  %vm412_vm11 = vcmp.lt.s32.totalorder %v1391_v41, 32 }
  0x7e   : > { %v231_v9 = vrot.slane %v1370_v1, %v1374_v8  ;;  %v238_v10 = vrot.slane %v224_v7, %v1374_v8  ;;  %vm400_vm12 = vcmp.ge.s32.totalorder %v1391_v41, 32  ;;  %vm437_vm14 = vcmp.lt.s32.totalorder %v1391_v41, 64 }
  0x7f   : > { %vm425_vm15 = vcmp.ge.s32.totalorder %v1391_v41, 64 }
  0x80   : > { %v241_v11 = vand.u32 1, %v231_v9  ;;  %v243_v12 = vand.u32 1, %v238_v10  ;;  %v239_v13 = vcombine.high %v231_v9, %v231_v9  ;;  %v240_v14 = vcombine.high %v238_v10, %v238_v10 }
  0x82   : > { %v245_v15 = vshrl.u32 %v241_v11, 16  ;;  %v246_v16 = vand.u32 65535, %v241_v11  ;;  %v257_v17 = vshrl.u32 %v243_v12, 16  ;;  %v258_v18 = vand.u32 65535, %v243_v12 }
  0x83   : > { %v242_v19 = vand.u32 1, %v239_v13  ;;  %v244_v20 = vand.u32 1, %v240_v14 }
  0x84   : > { %v247_v21 = vcvt.s32.f32 %v245_v15  ;;  %v249_v22 = vcvt.s32.f32 %v246_v16  ;;  %v259_v23 = vcvt.s32.f32 %v257_v17  ;;  %v261_v24 = vcvt.s32.f32 %v258_v18 }
  0x85   : > { %v251_v25 = vshrl.u32 %v242_v19, 16  ;;  %v252_v26 = vand.u32 65535, %v242_v19  ;;  %v263_v27 = vshrl.u32 %v244_v20, 16  ;;  %v264_v28 = vand.u32 65535, %v244_v20 }
  0x86   : > { %v248_v29 = vmul.f32 65536.0, %v247_v21  ;;  %v260_v30 = vmul.f32 65536.0, %v259_v23 }
  0x87   : > { %v253_v31 = vcvt.s32.f32 %v251_v25  ;;  %v255_v32 = vcvt.s32.f32 %v252_v26  ;;  %v265_v33 = vcvt.s32.f32 %v263_v27  ;;  %v267_v34 = vcvt.s32.f32 %v264_v28 }
  0x88   : > { %v1379_v35 = vadd.f32 %v249_v22, %v248_v29  ;;  %v1381_v36 = vadd.f32 %v261_v24, %v260_v30 }
  0x89   : > { %v254_v37 = vmul.f32 65536.0, %v253_v31  ;;  %v266_v38 = vmul.f32 65536.0, %v265_v33 }
  0x8a   : > { %279 = vrot.lane.b32.xlu0 %v1379_v35, %s1104_s26  ;;  %283 = vrot.lane.b32.xlu1 %v1381_v36, %s1104_s26 }
  0x8b   : > { %v1385_v39 = vadd.f32 %v255_v32, %v254_v37  ;;  %v1387_v40 = vadd.f32 %v267_v34, %v266_v38 }
  0x8e   : > { %281 = vrot.lane.b32.xlu1 %v1385_v39, %s1104_s26  ;;  %285 = vrot.lane.b32.xlu0 %v1387_v40, %s1104_s26 }
  0xfc   : > { %v280_v42 = vpop.permute.xlu0 %279  ;;  %v284_v43 = vpop.permute.xlu1 %283 }
 0x100   : > { %v282_v44 = vpop.permute.xlu1 %281  ;;  %v286_v45 = vpop.permute.xlu0 %285 }
 0x101   : > { %v288_v46 = vsel %vm287_vm1, %v284_v43, %v286_v45  ;;  %v291_v47 = vsel %vm287_vm1, %v286_v45, %v280_v42  ;;  %v290_v50 = vsel %vm287_vm1, %v280_v42, %v282_v44  ;;  %v289_v52 = vsel %vm287_vm1, %v282_v44, %v284_v43 }
 0x102   : > { %v292_v48 = vsel %vm275_vm2, %v291_v47, 0.0  ;;  %v299_v49 = vadd.f32 %v288_v46, %v1387_v40  ;;  %v297_v53 = vadd.f32 %v290_v50, %v1385_v39  ;;  %v298_v54 = vadd.f32 %v289_v52, %v1381_v36 }
 0x103   : > { %v296_v51 = vadd.f32 %v292_v48, %v1379_v35  ;;  %v1109_v46 = vmov 0  }
 0x104   : > { %310 = vrot.lane.b32.xlu1 %v299_v49, %s1105_s21  ;;  %893 = vset.pattern.permute.xlu0 %v1109_v46 }
 0x105   : > { %304 = vrot.lane.b32.xlu0 %v296_v51, %s1105_s21  ;;  %894 = vset.pattern.permute.xlu1 %v1109_v46 }
 0x108   : > { %306 = vrot.lane.b32.xlu1 %v297_v53, %s1105_s21 }
 0x109   : > { %308 = vrot.lane.b32.xlu0 %v298_v54, %s1105_s21 }
 0x176   : > { %v311_v55 = vpop.permute.xlu1 %310 }
 0x177   : > { %v305_v56 = vpop.permute.xlu0 %304 }
 0x178   : > { %v316_v57 = vsel %vm312_vm3, %v311_v55, %v305_v56 }
 0x179   : > { %v317_v58 = vsel %vm300_vm4, %v316_v57, 0.0  ;;  %vm610_vm4 = vcmask 1024  }
 0x17a   : > { %v321_v59 = vadd.f32 %v317_v58, %v296_v51  ;;  %v307_v60 = vpop.permute.xlu1 %306 }
 0x17b   : > { %v309_v61 = vpop.permute.xlu0 %308  ;;  %v315_v3 = vsel %vm312_vm3, %v305_v56, %v307_v60 }
 0x17c   : > { %v313_v62 = vsel %vm312_vm3, %v309_v61, %v311_v55  ;;  %v314_v63 = vsel %vm312_vm3, %v307_v60, %v309_v61  ;;  %329 = vrot.lane.b32.xlu0 %v321_v59, %s1106_s2  ;;  %v322_v4 = vadd.f32 %v315_v3, %v297_v53  ;;  %v613_v3 = vsel %vm599_vm13, %v1379_v35, 0.0 }
 0x17d   : > { %v323_v0 = vadd.f32 %v314_v63, %v298_v54  ;;  %v324_v2 = vadd.f32 %v313_v62, %v299_v49 }
 0x17f   : > { %335 = vrot.lane.b32.xlu1 %v324_v2, %s1106_s2 }
 0x180   : > { %333 = vrot.lane.b32.xlu0 %v323_v0, %s1106_s2 }
 0x183   : > { %331 = vrot.lane.b32.xlu1 %v322_v4, %s1106_s2 }
 0x1ee   : > { %v330_v5 = vpop.permute.xlu0 %329 }
 0x1f1   : > { %v336_v6 = vpop.permute.xlu1 %335 }
 0x1f2   : > { %v341_v7 = vsel %vm337_vm5, %v336_v6, %v330_v5  ;;  %v334_v9 = vpop.permute.xlu0 %333 }
 0x1f3   : > { %v342_v10 = vsel %vm325_vm6, %v341_v7, 0.0  ;;  %v338_v11 = vsel %vm337_vm5, %v334_v9, %v336_v6  ;;  %v616_v6 = vsel %vm599_vm13, %v1381_v36, 0.0  ;;  %v618_v7 = vsel %vm599_vm13, %v1387_v40, 0.0 }
 0x1f4   : > { %v346_v12 = vadd.f32 %v342_v10, %v321_v59  ;;  %v349_v13 = vadd.f32 %v338_v11, %v324_v2  ;;  %v222_v2 = vld [vmem:[%s1356_s30] sm:$0x3] }
 0x1f5   : > { %v332_v14 = vpop.permute.xlu1 %331 }
 0x1f6   : > { %v339_v15 = vsel %vm337_vm5, %v332_v14, %v334_v9  ;;  %v340_v16 = vsel %vm337_vm5, %v330_v5, %v332_v14  ;;  %354 = vrot.lane.b32.xlu0 %v346_v12, %s1107_s17  ;;  %360 = vrot.lane.b32.xlu1 %v349_v13, %s1107_s17 }
 0x1f7   : > { %v347_v17 = vadd.f32 %v340_v16, %v322_v4  ;;  %v348_v18 = vadd.f32 %v339_v15, %v323_v0  ;;  %v474_v0 = vld [vmem:[#allocation2] sm:$0x3]  ;;  %v614_v4 = vsel %vm599_vm13, %v1385_v39, 0.0 }
 0x1f8   : > { %v615_v5 = vadd.f32 %v614_v4, %v613_v3 }
 0x1fa   : > { %356 = vrot.lane.b32.xlu1 %v347_v17, %s1107_s17  ;;  %358 = vrot.lane.b32.xlu0 %v348_v18, %s1107_s17  ;;  %v617_v9 = vadd.f32 %v616_v6, %v615_v5 }
 0x1fc   : > { %v619_v10 = vadd.f32 %v618_v7, %v617_v9 }
 0x268   : > { %v355_v19 = vpop.permute.xlu0 %354  ;;  %v361_v20 = vpop.permute.xlu1 %360 }
 0x269   : > { %v366_v21 = vsel %vm362_vm7, %v361_v20, %v355_v19 }
 0x26a   : > { %v367_v22 = vsel %vm350_vm8, %v366_v21, 0.0  ;;  %v273_v21 = vadd.s32 256, %v1391_v41 }
 0x26b   : > { %v371_v23 = vadd.f32 %v367_v22, %v346_v12  ;;  %v274_v22 = vadd.s32 384, %v1391_v41 }
 0x26c   : > { %v359_v24 = vpop.permute.xlu0 %358  ;;  %v357_v25 = vpop.permute.xlu1 %356 }
 0x26d   : > { %v363_v26 = vsel %vm362_vm7, %v359_v24, %v361_v20  ;;  %v364_v27 = vsel %vm362_vm7, %v357_v25, %v359_v24  ;;  %379 = vrot.lane.b32.xlu0 %v371_v23, %s1108_s27  ;;  %v365_v30 = vsel %vm362_vm7, %v355_v19, %v357_v25  ;;  %v272_v20 = vadd.s32 128, %v1391_v41 }
 0x26e   : > { %v374_v28 = vadd.f32 %v363_v26, %v349_v13  ;;  %v373_v29 = vadd.f32 %v364_v27, %v348_v18  ;;  %v372_v31 = vadd.f32 %v365_v30, %v347_v17  ;;  %v487_v27 = vcvt.s32.f32 %v1391_v41 }
 0x26f   : > { %v490_v30 = vcvt.s32.f32 %v274_v22 }
 0x270   : > { %385 = vrot.lane.b32.xlu1 %v374_v28, %s1108_s27 }
 0x271   : > { %383 = vrot.lane.b32.xlu0 %v373_v29, %s1108_s27 }
 0x274   : > { %381 = vrot.lane.b32.xlu1 %v372_v31, %s1108_s27 }
 0x2df   : > { %v380_v32 = vpop.permute.xlu0 %379 }
 0x2e2   : > { %v386_v33 = vpop.permute.xlu1 %385 }
 0x2e3   : > { %v391_v34 = vsel %vm387_vm9, %v386_v33, %v380_v32  ;;  %v384_v37 = vpop.permute.xlu0 %383 }
 0x2e4   : > { %v392_v38 = vsel %vm375_vm10, %v391_v34, 0.0  ;;  %v388_v42 = vsel %vm387_vm9, %v384_v37, %v386_v33  ;;  %v491_v34 = vstv %s486_s7 }
 0x2e5   : > { %v396_v43 = vadd.f32 %v392_v38, %v371_v23  ;;  %v399_v44 = vadd.f32 %v388_v42, %v374_v28  ;;  %v488_v28 = vcvt.s32.f32 %v272_v20 }
 0x2e6   : > { %v382_v45 = vpop.permute.xlu1 %381 }
 0x2e7   : > { %v389_v47 = vsel %vm387_vm9, %v382_v45, %v384_v37  ;;  %v390_v48 = vsel %vm387_vm9, %v380_v32, %v382_v45  ;;  %404 = vrot.lane.b32.xlu0 %v396_v43, %s1110_s4  ;;  %410 = vrot.lane.b32.xlu1 %v399_v44, %s1110_s4  ;;  %v492_v37 = vadd.f32 %v491_v34, %v487_v27 }
 0x2e8   : > { %v397_v49 = vadd.f32 %v390_v48, %v372_v31  ;;  %v398_v50 = vadd.f32 %v389_v47, %v373_v29  ;;  %v489_v29 = vcvt.s32.f32 %v273_v21  ;;  %v493_v38 = vadd.f32 %v491_v34, %v488_v28 }
 0x2e9   : > { %v495_v45 = vadd.f32 %v491_v34, %v490_v30 }
 0x2eb   : > { %406 = vrot.lane.b32.xlu1 %v397_v49, %s1110_s4  ;;  %408 = vrot.lane.b32.xlu0 %v398_v50, %s1110_s4 }
 0x359   : > { %v405_v51 = vpop.permute.xlu0 %404  ;;  %v411_v52 = vpop.permute.xlu1 %410 }
 0x35a   : > { %v416_v53 = vsel %vm412_vm11, %v411_v52, %v405_v51 }
 0x35b   : > { %v417_v60 = vsel %vm400_vm12, %v416_v53, 0.0 }
 0x35c   : > { %v421_v62 = vadd.f32 %v417_v60, %v396_v43 }
 0x35d   : > { %v409_v54 = vpop.permute.xlu0 %408  ;;  %v407_v55 = vpop.permute.xlu1 %406 }
 0x35e   : > { %v413_v56 = vsel %vm412_vm11, %v409_v54, %v411_v52  ;;  %v415_v57 = vsel %vm412_vm11, %v405_v51, %v407_v55  ;;  %v414_v61 = vsel %vm412_vm11, %v407_v55, %v409_v54 }
 0x35f   : > { %v424_v58 = vadd.f32 %v413_v56, %v399_v44  ;;  %v422_v59 = vadd.f32 %v415_v57, %v397_v49  ;;  %v423_v63 = vadd.f32 %v414_v61, %v398_v50  ;;  %v494_v44 = vadd.f32 %v491_v34, %v489_v29 }
 0x361   : > { %435 = vrot.lane.b32.xlu1 %v424_v58, %s1111_s6  ;;  %431 = vrot.lane.b32.xlu0 %v422_v59, %s1111_s6 }
 0x365   : > { %429 = vrot.lane.b32.xlu0 %v421_v62, %s1111_s6  ;;  %433 = vrot.lane.b32.xlu1 %v423_v63, %s1111_s6 }
 0x369   : > { %477 = vperm.xlu0 %893, %v474_v0   ;;  %498 = vperm.xlu1 %894, %v222_v2  }
 0x388   : > { %620 = vadd.xlane.f32.xlu0 %v619_v10 }
 0x3d3   : > { %v432_v11 = vpop.permute.xlu0 %431  ;;  %v436_v12 = vpop.permute.xlu1 %435 }
 0x3d7   : > { %v430_v13 = vpop.permute.xlu0 %429  ;;  %v434_v15 = vpop.permute.xlu1 %433 }
 0x3d8   : > { %v441_v14 = vsel %vm437_vm14, %v436_v12, %v430_v13  ;;  %v440_v16 = vsel %vm437_vm14, %v430_v13, %v432_v11  ;;  %v438_v18 = vsel %vm437_vm14, %v434_v15, %v436_v12  ;;  %v439_v19 = vsel %vm437_vm14, %v432_v11, %v434_v15 }
 0x3d9   : > { %v442_v17 = vsel %vm425_vm15, %v441_v14, 0.0  ;;  %v447_v24 = vadd.f32 %v440_v16, %v422_v59  ;;  %v448_v25 = vadd.f32 %v439_v19, %v423_v63  ;;  %v449_v26 = vadd.f32 %v438_v18, %v424_v58 }
 0x3da   : > { %v446_v23 = vadd.f32 %v442_v17, %v421_v62 }
 0x3db   : > { %v460_v32 = vadd.f32 %v448_v25, %v447_v24  ;;  %v461_v33 = vadd.f32 %v449_v26, %v448_v25 }
 0x3dc   : > { %v459_v31 = vadd.f32 %v447_v24, %v446_v23 }
 0x3dd   : > { %v472_v42 = vadd.f32 %v460_v32, %v446_v23 }
 0x3de   : > { %v473_v43 = vadd.f32 %v461_v33, %v459_v31 }
 0x3e8   : > { %v478_v46 = vpop.permute.xlu0 %477  ;;  %v499_v54 = vpop.permute.xlu1 %498 }
 0x3e9   : > { %v480_v47 = vadd.f32 %v478_v46, %v446_v23  ;;  %v481_v48 = vadd.f32 %v478_v46, %v459_v31  ;;  %v482_v49 = vadd.f32 %v478_v46, %v472_v42  ;;  %v483_v50 = vadd.f32 %v478_v46, %v473_v43 }
 0x3ea   : > { %v269_v42 = vsub.f32 0.0, %v1370_v1 }
 0x3eb   : > { %v505_v51 = vsub.f32 %v492_v37, %v480_v47  ;;  %v506_v41 = vsub.f32 %v493_v38, %v481_v48  ;;  %v507_v52 = vsub.f32 %v494_v44, %v482_v49  ;;  %v508_v53 = vsub.f32 %v495_v45, %v483_v50 }
 0x3ec   : > { %v501_v9 = vsub.f32 %v499_v54, %v480_v47  ;;  %v502_v10 = vsub.f32 %v499_v54, %v481_v48  ;;  %v503_v12 = vsub.f32 %v499_v54, %v482_v49  ;;  %v504_v13 = vsub.f32 %v499_v54, %v483_v50 }
 0x3ed   : > { %v509_v55 = vadd.f32 %v505_v51, %v499_v54  ;;  %v510_v56 = vadd.f32 %v506_v41, %v499_v54  ;;  %v511_v57 = vadd.f32 %v507_v52, %v499_v54  ;;  %v512_v58 = vadd.f32 %v508_v53, %v499_v54 }
 0x3ee   : > { %v513_v15 = vadd.f32 %v501_v9, %v1379_v35  ;;  %v514_v17 = vadd.f32 %v502_v10, %v1385_v39  ;;  %v515_v19 = vadd.f32 %v503_v12, %v1381_v36  ;;  %v516_v23 = vadd.f32 %v504_v13, %v1387_v40 }
 0x3ef   : > { %v767_v59 = vadd.f32 -1.0, %v509_v55  ;;  %v768_v60 = vadd.f32 -1.0, %v510_v56  ;;  %v769_v61 = vadd.f32 -1.0, %v511_v57  ;;  %v770_v62 = vadd.f32 -1.0, %v512_v58 }
 0x3f0   : > { %896 = vrcp.f32 %v509_v55  ;;  %v612_v55 = vld [vmem:[#allocation2] sm:$0x3] }
 0x3f1   : > { %v521_v63 = vadd.f32 %v767_v59, %v1379_v35  ;;  %v522_v0 = vadd.f32 %v768_v60, %v1385_v39  ;;  %v523_v2 = vadd.f32 %v769_v61, %v1381_v36  ;;  %v524_v3 = vadd.f32 %v770_v62, %v1387_v40 }
 0x3f2   : > { %898 = vrcp.f32 %v510_v56 }
 0x3f3   : > { %vm525_vm0 = vcmp.lt.f32.partialorder %v521_v63, 0.5  ;;  %vm526_vm1 = vcmp.lt.f32.partialorder %v522_v0, 0.5  ;;  %vm527_vm2 = vcmp.lt.f32.partialorder %v523_v2, 0.5  ;;  %vm528_vm3 = vcmp.lt.f32.partialorder %v524_v3, 0.5 }
 0x3f4   : > { %v529_v4 = vsel %vm525_vm0, 1.0, %v521_v63  ;;  %v530_v5 = vsel %vm526_vm1, 1.0, %v522_v0  ;;  %v531_v6 = vsel %vm527_vm2, 1.0, %v523_v2  ;;  %v532_v7 = vsel %vm528_vm3, 1.0, %v524_v3 }
 0x3f5   : > { %900 = vrcp.f32 %v529_v4 }
 0x3f6   : > { %902 = vrcp.f32 %v530_v5 }
 0x3f7   : > { %904 = vrcp.f32 %v531_v6 }
 0x3f8   : > { %906 = vrcp.f32 %v532_v7 }
 0x3f9   : > { %908 = vrcp.f32 %v511_v57 }
 0x3fa   : > { %910 = vrcp.f32 %v512_v58  ;;  %v897_v11 = vpop.eup %896 }
 0x3fb   : > { %v545_v21 = vmul.f32 %v897_v11, %v501_v9 }
 0x3fc   : > { %v899_v14 = vpop.eup %898 }
 0x3fd   : > { %v546_v25 = vmul.f32 %v899_v14, %v502_v10 }
 0x3ff   : > { %v901_v16 = vpop.eup %900 }
 0x400   : > { %v903_v18 = vpop.eup %902  ;;  %v537_v20 = vmul.f32 %v901_v16, %v513_v15 }
 0x401   : > { %v905_v22 = vpop.eup %904  ;;  %v538_v24 = vmul.f32 %v903_v18, %v514_v17 }
 0x402   : > { %v907_v26 = vpop.eup %906  ;;  %v539_v27 = vmul.f32 %v905_v22, %v515_v19  ;;  %v549_v28 = vsub.f32 %v537_v20, %v545_v21 }
 0x403   : > { %v909_v29 = vpop.eup %908  ;;  %v540_v30 = vmul.f32 %v907_v26, %v516_v23  ;;  %v550_v31 = vsub.f32 %v538_v24, %v546_v25 }
 0x404   : > { %v911_v35 = vpop.eup %910  ;;  %v547_v32 = vmul.f32 %v909_v29, %v503_v12 }
 0x405   : > { %v548_v33 = vmul.f32 %v911_v35, %v504_v13  ;;  %v558_v39 = vcombine.low %v549_v28, %v550_v31 }
 0x406   : > { %v551_v34 = vsub.f32 %v539_v27, %v547_v32 }
 0x407   : > { %v552_v37 = vsub.f32 %v540_v30, %v548_v33  ;;  %v566_v38 = vrot.slane %v558_v39, %v1374_v8 }
 0x409   : > { %v559_v36 = vcombine.low %v551_v34, %v552_v37 }
 0x40b   : > { %v573_v40 = vrot.slane %v559_v36, %v1374_v8 }
 0x40d   : > { %v574_v43 = vcombine.low %v566_v38, %v573_v40 }
 0x40f   : > { %v576_v44 = vmul.f32 %v574_v43, %v269_v42 }
 0x411   : > { %v578_v45 = vcombine.high %v576_v44, %v576_v44  ;;  %v585_v46 = vrot.slane %v576_v44, %v1374_v8 }
 0x413   : > { %v592_v47 = vrot.slane %v578_v45, %v1374_v8  ;;  %v593_v48 = vcombine.high %v585_v46, %v585_v46  ;;  %v600_v50 = vsel %vm599_vm13, %v585_v46, 0.0  ;;  %v553_v8 = vld [vmem:[#allocation3] sm:$0x3] }
 0x415   : > { %v594_v49 = vcombine.high %v592_v47, %v592_v47  ;;  %v601_v51 = vsel %vm599_vm13, %v593_v48, 0.0  ;;  %v603_v52 = vsel %vm599_vm13, %v592_v47, 0.0  ;;  %v621_v56 = vpop.xlane.xlu0 %620 }
 0x416   : > { %v602_v41 = vadd.f32 %v601_v51, %v600_v50  ;;  %v622_v57 = vadd.f32 %v621_v56, %v612_v55 }
 0x417   : > { %v605_v1 = vsel %vm599_vm13, %v594_v49, 0.0 }
 0x418   : > { %v604_v53 = vadd.f32 %v603_v52, %v602_v41  ;;  %623 = vst.msk [vmem:[#allocation2] sm:$0x3] %vm610_vm4, %v622_v57 }
 0x41a   : > { %v606_v54 = vadd.f32 %v605_v1, %v604_v53 }
 0x41c   : > { %607 = vadd.xlane.f32.xlu1 %v606_v54 }
 0x4a6   : > { %627 = sbr.rel (%p771_p8) target bundleno = 1205 (0x4b5), region = 44 }
 0x4a9   : > { %v608_v58 = vpop.xlane.xlu1 %607 }
 0x4aa   : > { %v609_v59 = vadd.f32 %v608_v58, %v553_v8 }
 0x4ac   : > { %611 = vst.msk [vmem:[#allocation3] sm:$0x3] %vm610_vm4, %v609_v59 }
 0x4b3   : > { %v628_v60 = vld [vmem:[#allocation3] sm:$0x3] }
 0x4b4   : > { %629 = vst.msk [vmem:[%s1367_s28] sm:$0x3] %vm610_vm4, %v628_v60 }
 0x4b5 PF: > { %s1546_s29 = sld [smem:[#allocation14_spill]]  ;;  %s1547_s3 = sld [smem:[#allocation16_spill]] }
 0x4b6   : > { %s1548_s16 = sld [smem:[#allocation20_spill]]  ;;  %s644_s26 = sshll.u32 %s1367_s28, 4  ;;  %s645_s26 = int_to_ptr.vmem [resolvable:$true] %s644_s26 }
 0x4b7   : > { %s631_s21 = scalar_lea.sflag [#allocation6], %s1352_s25  ;;  %s972_s2 = scalar_lea.vmem %s645_s26, 32 }
 0x4b8   : > { %p973_p13 = scmp.ne.s32.totalorder %s645_s26, %s972_s2  ;;  %s1112_s15 = smov [#allocation9]  }
 0x4b9   : > { %s976_s17 = sshll.u32 %s1112_s15, 4  ;;  %s977_s17 = int_to_ptr.vmem [resolvable:$false] %s976_s17 }
 0x4ba   : > { %s978_s27 = scalar_lea.vmem %s977_s17, 64  ;;  %p979_p3 = scmp.lt.s32.totalorder %s645_s26, %s977_s17 }
 0x4bb   : > { %s773_s5 = sshll.u32 %s1546_s29, 5  ;;  %p1550_p0 = scmp.ne.s32.totalorder %s1547_s3, 0 }
 0x4bc   : > { %s1549_s20 = smov %s1548_s16  ;;  %s1448_s23 = scalar_lea.hbm %s1548_s16, %s773_s5 }
 0x4bd   : > { %p974_p10 = pnand %p973_p13, %p1550_p0  ;;  %p980_p6 = scmp.lt.s32.totalorder %s978_s27, %s972_s2 }
 0x4bf   : > { %p975_p4 = pneg %p974_p10  ;;  %p981_p12 = por %p980_p6, %p979_p3 }
 0x4c1   : > { %p982_p2 = pnand %p981_p12, %p975_p4 }
 0x4c3   : > { %985 = shalt.err (!%p982_p2)
}
 0x4c4   : > { %s986_s25 = scalar_lea.hbm %s1448_s23, 32  ;;  %s990_s6 = scalar_lea.hbm %s1549_s20, 64 }
 0x4c5   : > { %p987_p11 = scmp.ne.s32.totalorder %s1448_s23, %s986_s25  ;;  %p991_p9 = scmp.lt.u32.totalorder %s1448_s23, %s1549_s20 }
 0x4c6   : > { %p992_p1 = scmp.lt.u32.totalorder %s990_s6, %s986_s25  ;;  %p994_p13 = scmp.lt.u32.totalorder %s986_s25, %s1448_s23 }
 0x4c7   : > { %p988_p7 = pnand %p987_p11, %p1550_p0 }
 0x4c8   : > { %p993_p8 = por %p992_p1, %p991_p9 }
 0x4c9   : > { %p989_p5 = pneg %p988_p7 }
 0x4ca   : > { %p995_p10 = por %p994_p13, %p993_p8 }
 0x4cc   : > { %p996_p4 = pnand %p995_p10, %p989_p5 }
 0x4ce   : > { %999 = shalt.err (!%p996_p4)
}
 0x4cf   : > { %780 = dma.vmem_to_hbm [thread:$0]  (%p1550_p0), %s645_s26, 32, %s1448_s23, %s631_s21  }
 0x4d0 PF: > { %s1551_s7 = sld [smem:[#allocation13_spill]]  ;;  %s1552_s29 = sld [smem:[#allocation17_spill]] }
 0x4d1   : > { %p794_p3 = scmp.ge.s32.totalorder %s1098_s19, 2 }
 0x4d6   : > { %s656_s5 = sand.u32 1, %s1551_s7   ;;  %p1553_p6 = scmp.ne.s32.totalorder %s1552_s29, 0 }
 0x4d7   : > { %s657_s30 = scalar_lea.sflag [#allocation6], %s656_s5 }
 0x4d8   : > { %p790_p12 = pnand %p794_p3, %p1553_p6 }
 0x4da   : > { %1053 = dma.done.wait (!%p790_p12), %s657_s30, 32  }
 0x4db   : > { %1055 = vsyncadd (!%p790_p12), %s657_s30, 4294967264  ;;  %s21_s19 = sadd.s32 1, %s1098_s19   ;;  %s1554_s15 = sld [smem:[#allocation15_spill]] }
 0x4dc   : > { %p18_p2 = scmp.ge.s32.totalorder %s21_s19, 6   ;;  %s1555_s17 = sld [smem:[#allocation18_spill]] }
 0x4dd   : > { %s1556_s9 = smov %s1062_s10  ;;  %s1557_s10 = smov %s1066_s11 }
 0x4de   : > { %s1558_s11 = smov %s1307_s24  ;;  %s1559_s12 = smov %s1074_s13 }
 0x4df   : > { %s1560_s13 = smov %s1078_s14  ;;  %s1561_s14 = smov %s1304_s0 }
 0x4e0   : > { %s1562_s16 = smov %s1094_s18  ;;  %s1563_s18 = smov %s1569_s22 }
 0x4e1   :  { %20 = sbr.rel (!%p18_p2) target bundleno = 14 (0xe), region = 94 }
 0x4e8   :  { %662 = vsyncpa [#allocation5], 1 }
 0x4e9   :  { %664 = vsyncpa [#allocation5 + $0x1], 1 }
 0x4ea   :  { %665 = vsyncpa [#allocation8], 1 }
 0x4eb   :  { %667 = vsyncpa [#allocation8 + $0x1], 1 }
 0x4ec   :  { %668 = vsyncpa [#allocation6], 1 }
 0x4ed   :  { %670 = vsyncpa [#allocation6 + $0x1], 1 }

</bundles_post_ra>
